<compile_context>
chip_gen: v7x
topology: tpu7x:2x2x1
jax: 0.10.0
libtpu: 0.0.40
codegen_flags: <defaults>
</compile_context>

<pallas_src>
import math

import jax
import jax.numpy as jnp
import numpy as np
from jax.experimental import pallas as pl
from jax.experimental.pallas import tpu as pltpu


_LANE_TARGET = 128  # input elements per lane tile (whole rows).  Small tile ->
                    # small expansion matrix and few MACs/output element, while
                    # the output lane dim (4*lt >= 512) stays unmasked.


def _sublane_multiple(dtype):
    """Native sublane packing multiple for the channel (second-minor) dim."""
    return {4: 8, 2: 16, 1: 32}.get(jnp.dtype(dtype).itemsize, 8)


def _rows_per_tile(h, w):
    """Rows of the input image per lane tile.  Prefer tiles whose flattened
    width rt*w is a multiple of 128 lanes and <= 512 (bounds the expansion
    matmul's MACs/element and G's size); otherwise fall back sensibly."""
    aligned = [d for d in range(1, h + 1)
               if h % d == 0 and (d * w) % 128 == 0 and d * w <= 512]
    if aligned:
        return min(aligned)
    if h * w <= 512:
        return h                       # whole image per tile (block == full dim)
    fallback = [d for d in range(1, h + 1) if h % d == 0 and d * w <= 512]
    return max(fallback) if fallback else 1


def _expansion_matrix(rt, w, dtype):
    """0/1 matrix G (rt*w, 4*rt*w): (x_tile @ G) is the 2x nearest-neighbour
    upsample of an (rt, w) row block, flattened row-major to (2*rt, 2*w)."""
    lt = rt * w
    m = np.arange(4 * lt)
    # output flat index m = (2*hi + r)*2w + 2*wi + s  ->  input index hi*w + wi
    src = (m // (4 * w)) * w + (m % (2 * w)) // 2
    g = (np.arange(lt)[:, None] == src[None, :]).astype(np.float32)
    return jnp.asarray(g, dtype=dtype)


def _pick_tile(total, multiple, max_tile):
    """Largest divisor of `total` that is a multiple of `multiple` and at most
    `max_tile`; falls back to the smallest aligned divisor (soft budget)."""
    divs = [d for d in range(multiple, total + 1, multiple) if total % d == 0]
    if not divs:
        return None
    fit = [d for d in divs if d <= max_tile]
    return max(fit) if fit else min(divs)


def _tile_budget_bytes():
    """Per-step VMEM working-set budget, by TPU generation."""
    try:
        cap = int(getattr(pltpu.get_tpu_info(), "vmem_capacity_bytes", 0))
    except Exception:
        cap = 0
    if cap >= (100 << 20):      # v5e / v6e: 128 MiB physical VMEM
        return 48 << 20
    return 24 << 20             # v7x (64 MiB physical) or unknown: keep headroom


def _vmem_limit(need_bytes):
    """Scoped-VMEM limit sized from the actual blocks plus headroom."""
    return int(max(32 << 20, need_bytes + (8 << 20)))


def _up_kernel(x_ref, g_ref, o_ref):
    # x: (1, ct, lt), g: (lt, 4*lt), o: (1, ct, 4*lt).  One MXU matmul does the
    # whole nearest-neighbour expansion, lane-dense in and out (no relayout).
    # G is 0/1, so HIGHEST precision makes the f32 matmul exact.
    o_ref[0] = jnp.dot(
        x_ref[0], g_ref[...],
        preferred_element_type=jnp.float32,
        precision=jax.lax.Precision.HIGHEST,
    ).astype(o_ref.dtype)


def _skip_copy_kernel(d_ref, up_out_ref, o_ref):
    del up_out_ref   # present only to alias the output buffer (it already holds
                     # the upsampled channels); never read.
    o_ref[...] = d_ref[...]


def upsample_concat(inputs, down_outputs):
    """out = concat([nearest_upsample_2x(inputs), down_outputs], axis=1)."""
    b, c_in, h, w = inputs.shape
    b2, c_d, h2, w2 = down_outputs.shape
    assert b == b2 and h2 == 2 * h and w2 == 2 * w, "shape mismatch"
    assert inputs.dtype == down_outputs.dtype, "torch.cat requires matching dtypes"

    dtype = inputs.dtype
    itemsize = jnp.dtype(dtype).itemsize
    sub = _sublane_multiple(dtype)
    hw, hw4 = h * w, 4 * h * w
    c_total = c_in + c_d

    rt = _rows_per_tile(h, w)
    lt, lt4 = rt * w, 4 * rt * w
    n_lane = h // rt
    g_mat = _expansion_matrix(rt, w, dtype)

    x_flat = inputs.reshape(b, c_in, hw)          # lane-dense views (free)
    d_flat = down_outputs.reshape(b, c_d, hw4)

    budget = _tile_budget_bytes()
    aligned = (c_in % sub == 0) and (c_d % sub == 0)

    if aligned:
        # ---------------- call 1: upsample -> output channels [0, c_in) ------
        ct_u_cap = max(sub, (budget // (2 * itemsize) - 4 * lt * lt) // (5 * lt))
        ct_u = _pick_tile(c_in, sub, ct_u_cap)
        up_need = 2 * (ct_u * (lt + lt4) + lt * lt4) * itemsize

        up_out = pl.pallas_call(
            _up_kernel,
            out_shape=jax.ShapeDtypeStruct((b, c_total, hw4), dtype),
            grid_spec=pltpu.PrefetchScalarGridSpec(
                num_scalar_prefetch=0,
                grid=(b, c_in // ct_u, n_lane),
                in_specs=[
                    pl.BlockSpec((1, ct_u, lt), lambda bi, ci, li: (bi, ci, li)),
                    # constant block index -> fetched once, stays resident
                    pl.BlockSpec((lt, lt4), lambda bi, ci, li: (0, 0)),
                ],
                out_specs=pl.BlockSpec((1, ct_u, lt4),
                                       lambda bi, ci, li: (bi, ci, li)),
            ),
            compiler_params=pltpu.CompilerParams(
                dimension_semantics=("parallel", "parallel", "parallel"),
                vmem_limit_bytes=_vmem_limit(up_need),
            ),
            cost_estimate=pl.CostEstimate(
                flops=2 * b * c_in * hw * lt4,
                transcendentals=0,
                bytes_accessed=(b * c_in * (hw + hw4) + lt * lt4) * itemsize),
        )(x_flat, g_mat)

        # ------ call 2: skip copy -> output channels [c_in, c_total), aliased
        ct_d = _pick_tile(math.gcd(c_in, c_d), sub,
                          max(sub, budget // (4 * lt4 * itemsize)))
        cp_need = 4 * ct_d * lt4 * itemsize
        ch_off = c_in // ct_d        # exact: ct_d divides gcd(c_in, c_d)

        out_flat = pl.pallas_call(
            _skip_copy_kernel,
            out_shape=jax.ShapeDtypeStruct((b, c_total, hw4), dtype),
            grid_spec=pltpu.PrefetchScalarGridSpec(
                num_scalar_prefetch=0,
                grid=(b, c_d // ct_d, n_lane),
                in_specs=[
                    pl.BlockSpec((1, ct_d, lt4), lambda bi, ci, li: (bi, ci, li)),
                    pl.BlockSpec(memory_space=pl.ANY),   # aliased up_out (HBM)
                ],
                out_specs=pl.BlockSpec(
                    (1, ct_d, lt4), lambda bi, ci, li: (bi, ch_off + ci, li)),
            ),
            compiler_params=pltpu.CompilerParams(
                dimension_semantics=("parallel", "parallel", "parallel"),
                vmem_limit_bytes=_vmem_limit(cp_need),
            ),
            cost_estimate=pl.CostEstimate(
                flops=0, transcendentals=0,
                bytes_accessed=2 * b * c_d * hw4 * itemsize),
            input_output_aliases={1: 0},   # write skip channels in place
        )(d_flat, up_out)
    else:
        # Fallback: channel counts not aligned to the dtype's sublane packing.
        # Channels stay untiled (blocks equal the full channel dims, which the
        # (8,128) rule allows) but the lane dim is still tiled so VMEM stays
        # bounded.  TODO(synk): channel-tile this path too if misaligned
        # channel counts ever appear with large C.
        def fused_kernel(x_ref, g_ref, d_ref, o_ref):
            up = jnp.dot(x_ref[0], g_ref[...],
                         preferred_element_type=jnp.float32,
                         precision=jax.lax.Precision.HIGHEST)
            o_ref[0, pl.ds(0, c_in)] = up.astype(o_ref.dtype)
            o_ref[0, pl.ds(c_in, c_d)] = d_ref[0]

        need = 2 * (c_in * lt + (c_d + c_total) * lt4 + lt * lt4) * itemsize
        out_flat = pl.pallas_call(
            fused_kernel,
            out_shape=jax.ShapeDtypeStruct((b, c_total, hw4), dtype),
            grid_spec=pltpu.PrefetchScalarGridSpec(
                num_scalar_prefetch=0,
                grid=(b, n_lane),
                in_specs=[
                    pl.BlockSpec((1, c_in, lt), lambda bi, li: (bi, 0, li)),
                    pl.BlockSpec((lt, lt4), lambda bi, li: (0, 0)),
                    pl.BlockSpec((1, c_d, lt4), lambda bi, li: (bi, 0, li)),
                ],
                out_specs=pl.BlockSpec((1, c_total, lt4),
                                       lambda bi, li: (bi, 0, li)),
            ),
            compiler_params=pltpu.CompilerParams(
                dimension_semantics=("parallel", "parallel"),
                vmem_limit_bytes=_vmem_limit(need),
            ),
            cost_estimate=pl.CostEstimate(
                flops=2 * b * c_in * hw * lt4,
                transcendentals=0,
                bytes_accessed=(b * (c_in * hw + c_d * hw4 + c_total * hw4)
                                + lt * lt4) * itemsize),
        )(x_flat, g_mat, d_flat)

    return out_flat.reshape(b, c_total, 2 * h, 2 * w)


if __name__ == "__main__":
    key = jax.random.PRNGKey(0)
    k1, k2, k3, k4 = jax.random.split(key, 4)

    # Small shapes consistent with the module; 8-aligned channels exercise the
    # aligned (production) two-call code path.
    B, IN_FEAT, OUT_FEAT, H, W = 2, 8, 8, 16, 16

    inputs = jax.random.normal(k1, (B, IN_FEAT, H, W), dtype=jnp.float32)
    down_outputs = jax.random.normal(
        k2, (B, OUT_FEAT, 2 * H, 2 * W), dtype=jnp.float32)

    # ConvTranspose2d params are declared in UpSample.__init__ but never used
    # in forward(); built only for fidelity with the module definition.
    deconv_weight = jax.random.normal(k3, (IN_FEAT, OUT_FEAT, 2, 2),
                                      dtype=jnp.float32)
    deconv_bias = jax.random.normal(k4, (OUT_FEAT,), dtype=jnp.float32)
    del deconv_weight, deconv_bias  # unused by UpSample.forward

    out = jax.block_until_ready(upsample_concat(inputs, down_outputs))

    # Pure-JAX reference for correctness check.
    up_ref = jnp.repeat(jnp.repeat(inputs, 2, axis=2), 2, axis=3)
    ref = jnp.concatenate([up_ref, down_outputs], axis=1)

    assert out.shape == (B, IN_FEAT + OUT_FEAT, 2 * H, 2 * W), out.shape
    assert jnp.allclose(out, ref), "mismatch vs reference"
    print("KERNEL_OK")
</pallas_src>

<mosaic_0001>
module attributes {stable_mosaic.version = 11 : i64} {
  func.func @_up_kernel(%arg0: i32, %arg1: i32, %arg2: i32, %arg3: memref<1x8x128xf32, #tpu.memory_space<vmem>>, %arg4: memref<128x512xf32, #tpu.memory_space<vmem>>, %arg5: memref<1x8x512xf32, #tpu.memory_space<vmem>>) attributes {dimension_semantics = [#tpu.dimension_semantics<parallel>, #tpu.dimension_semantics<parallel>, #tpu.dimension_semantics<parallel>], iteration_bounds = array<i64: 2, 1, 2>, scalar_prefetch = 0 : i64, scratch_operands = 0 : i64, tpu.core_type = #tpu.core_type<tc>, window_params = [{transform_indices = @transform_0, window_bounds = array<i64: 1, 8, 128>}, {pipeline_mode = #tpu.pipeline_mode<synchronous>, transform_indices = @transform_1, window_bounds = array<i64: 128, 512>}, {transform_indices = @transform_2, window_bounds = array<i64: 1, 8, 512>}]} {
    %c0 = arith.constant 0 : index
    %c0_0 = arith.constant 0 : index
    %c0_1 = arith.constant 0 : index
    %0 = vector.load %arg3[%c0, %c0_0, %c0_1] : memref<1x8x128xf32, #tpu.memory_space<vmem>>, vector<1x8x128xf32>
    %1 = vector.shape_cast %0 : vector<1x8x128xf32> to vector<8x128xf32>
    %c0_2 = arith.constant 0 : index
    %c0_3 = arith.constant 0 : index
    %2 = vector.load %arg4[%c0_2, %c0_3] : memref<128x512xf32, #tpu.memory_space<vmem>>, vector<128x512xf32>
    %cst = arith.constant dense<0.000000e+00> : vector<8x512xf32>
    %3 = tpu.matmul %1, %2, %cst {dimension_numbers = #tpu.dot_dimension_numbers<[1], [0], [0], [1], [0, 0, 1, 1], [], []>, precision = #tpu.contract_precision<fp32>} : vector<8x128xf32>, vector<128x512xf32>, vector<8x512xf32> -> vector<8x512xf32>
    %c0_4 = arith.constant 0 : index
    %c0_5 = arith.constant 0 : index
    %c0_6 = arith.constant 0 : index
    %4 = vector.load %arg5[%c0_4, %c0_5, %c0_6] : memref<1x8x512xf32, #tpu.memory_space<vmem>>, vector<1x8x512xf32>
    %5 = vector.shape_cast %4 : vector<1x8x512xf32> to vector<8x512xf32>
    %6 = vector.shape_cast %3 : vector<8x512xf32> to vector<1x8x512xf32>
    tpu.vector_store %arg5[%c0_4, %c0_5, %c0_6], %6 {strides = array<i32>} : memref<1x8x512xf32, #tpu.memory_space<vmem>>, vector<1x8x512xf32>,
    return
  }
  func.func @transform_0(%arg0: i32, %arg1: i32, %arg2: i32) -> (i32, i32, i32) {
    %c0_i32 = arith.constant 0 : i32
    return %arg0, %arg1, %arg2 : i32, i32, i32
  }
  func.func @transform_1(%arg0: i32, %arg1: i32, %arg2: i32) -> (i32, i32) {
    %c0_i32 = arith.constant 0 : i32
    %c0_i32_0 = arith.constant 0 : i32
    %c0_i32_1 = arith.constant 0 : i32
    return %c0_i32, %c0_i32_0 : i32, i32
  }
  func.func @transform_2(%arg0: i32, %arg1: i32, %arg2: i32) -> (i32, i32, i32) {
    %c0_i32 = arith.constant 0 : i32
    return %arg0, %arg1, %arg2 : i32, i32, i32
  }
}

</mosaic_0001>

<bundles_post_ra>
// kernel: tpu_custom_call.1
= control target key start
LH: loop header
LB: loop body
LE: loop exit
PB: predicated region body
PF: predicated region fallthrough
CT: control target
= control target key end

     0   :  { %s3907_s0 = inlined_call_operand.hbm [shape: f32[2,8,256], index: 0, kind: input, shape index: {}]   ;;  %s3908_s1 = inlined_call_operand.hbm [shape: f32[128,512], index: 1, kind: input, shape index: {}]   ;;  %s3909_s2 = inlined_call_operand.hbm [shape: f32[2,16,1024], index: 2, kind: output, shape index: {}]  }
   0x1   :  { %4112 = sst [smem:[#allocation81_spill]] %s3908_s1 }
   0x2   :  { %7 = vsyncpa [#allocation3], 0 }
   0x3   :  { %9 = vsyncpa [#allocation3 + $0x1], 0 }
   0x4   :  { %10 = vsyncpa [#allocation6], 0 }
   0x5   :  { %11 = vsyncpa [#allocation4], 0 }
   0x6   :  { %13 = vsyncpa [#allocation4 + $0x1], 0  ;;  %s2804_s9 = smov 0   ;;  %s2806_s10 = smov 0  }
   0x7   :  { %s2808_s11 = smov 0   ;;  %s2810_s12 = smov 0  }
   0x8   :  { %s2812_s13 = smov 0   ;;  %s2814_s14 = smov 0  }
   0x9   :  { %s2816_s15 = smov 0   ;;  %s2818_s16 = smov 0  }
   0xa LB: > { %s2107_s17 = sadd.s32 4294967295, %s2781_s16   ;;  %s2108_s18 = sadd.s32 4294967294, %s2781_s16   ;;  %s2781_s16 = sphi %s2818_s16, %s19_s16   ;;  %s2777_s15 = sphi %s2816_s15, %s4374_s15   ;;  %s2773_s14 = sphi %s2814_s14, %s4373_s14   ;;  %s2769_s13 = sphi %s2812_s13, %s4372_s13   ;;  %s2765_s12 = sphi %s2810_s12, %s4371_s12   ;;  %s2761_s11 = sphi %s2808_s11, %s4370_s11   ;;  %s2757_s10 = sphi %s2806_s10, %s4369_s10   ;;  %s2753_s9 = sphi %s2804_s9, %s4368_s9  }
   0xb   : > { %p62_p0 = scmp.ne.s32.totalorder %s2757_s10, %s2753_s9  ;;  %p2848_p1 = scmp.eq.s32.totalorder %s2107_s17, 0 }
   0xc   : > { %p2852_p2 = scmp.eq.s32.totalorder %s2107_s17, 3  ;;  %p117_p3 = scmp.eq.s32.totalorder %s2108_s18, 3 }
   0xd   : > { %s4113_s19 = scalar_select %p2848_p1, 1, 0 }
   0xe   : > { %s4114_s20 = scalar_select %p2852_p2, 1, 0 }
   0xf   : > { %p2858_p4 = por %p2848_p1, %p62_p0  ;;  %p2109_p5 = scmp.ge.s32.totalorder %s2781_s16, 1 }
  0x10   : > { %p2863_p6 = por %p117_p3, %p62_p0  ;;  %p124_p7 = scmp.lt.s32.totalorder %s2781_s16, 5 }
  0x11   : > { %s4115_s21 = scalar_select %p2858_p4, 1, 0 }
  0x12   : > { %s4116_s22 = scalar_select %p2863_p6, 1, 0 }
  0x13   : > { %p2868_p8 = pnand %p2109_p5, %p124_p7  ;;  %s2783_s24 = smov [#allocation5]  }
  0x14   : > { %4117 = sst [smem:[#allocation11_spill]] %s4116_s22  ;;  %s136_s25 = sshll.u32 %s2783_s24, 4  ;;  %s137_s25 = int_to_ptr.vmem [resolvable:$true] %s136_s25 }
  0x15   : > { %s4118_s23 = scalar_select %p2868_p8, 1, 0 }
  0x16   : > { %p2537_p9 = pneg %p2868_p8  ;;  %s4120_s1 = sld [smem:[#allocation81_spill]] }
  0x18   : > { %p2876_p10 = pnand %p2537_p9, %p2848_p1 }
  0x1a   : > { %p2623_p12 = pneg %p2876_p10 }
  0x1c   : > { %s2621_s29 = scalar_lea.hbm %s4120_s1, 8192 }
  0x1d   : > { %p2622_p11 = scmp.ne.s32.totalorder %s4120_s1, %s2621_s29  ;;  %p2628_p3 = scmp.lt.u32.totalorder %s2621_s29, %s4120_s1 }
  0x1f   : > { %p2624_p13 = pnand %p2623_p12, %p2622_p11 }
  0x21   : > { %p2625_p0 = pneg %p2624_p13 }
  0x23   : > { %p2630_p5 = pnand %p2628_p3, %p2625_p0 }
  0x25   : > { %2633 = shalt.err (!%p2630_p5)
}
  0x26   : > { %s2634_s6 = scalar_lea.vmem %s137_s25, 8192  ;;  %p2642_p1 = scmp.lt.s32.totalorder %s137_s25, %s137_s25 }
  0x27   : > { %p2635_p7 = scmp.ne.s32.totalorder %s137_s25, %s2634_s6  ;;  %p2643_p4 = scmp.lt.s32.totalorder %s2634_s6, %s2634_s6 }
  0x29   : > { %p2637_p9 = pnand %p2635_p7, %p2623_p12  ;;  %p2644_p8 = por %p2643_p4, %p2642_p1 }
  0x2b   : > { %p2638_p6 = pneg %p2637_p9 }
  0x2d   : > { %p2645_p2 = pnand %p2644_p8, %p2638_p6 }
  0x2f   : > { %2648 = shalt.err (!%p2645_p2)
}
  0x30   : > { %s2784_s7 = smov 512   ;;  %s2785_s8 = smov 32  }
  0x31   : > { %2540 = dma.hbm_to_vmem [thread:$0]  (!%p2876_p10), %s4120_s1, 8192, %s137_s25, [#allocation6], %s2784_s7, %s2784_s7, %s2785_s8  }
  0x32   : > { %s31_s24 = sadd.s32 1, %s2773_s14  ;;  %s38_s27 = sadd.s32 1, %s2777_s15 }
  0x33   : > { %p32_p1 = scmp.ge.s32.totalorder %s31_s24, 2  ;;  %s49_s28 = sadd.s32 1, %s2761_s11 }
  0x34   : > { %p56_p2 = scmp.ne.s32.totalorder %s2761_s11, %s2757_s10  ;;  %p57_p4 = scmp.eq.s32.totalorder %s2781_s16, 0 }
  0x35   : > { %s4376_s24 = smov (%p32_p1, %s31_s24), 0  ;;  %s4378_s27 = smov (!%p32_p1, %s38_s27), %s2777_s15 }
  0x36   : > { %4121 = sst [smem:[#allocation12_spill]] %s4376_s24  ;;  %s45_s29 = ssub.s32 %s2773_s14, %s4376_s24 }
  0x37   : > { %p40_p6 = scmp.ge.s32.totalorder %s4378_s27, 2  ;;  %p4122_p8 = scmp.ne.s32.totalorder %s4114_s20, 0 }
  0x38   : > { %p2913_p10 = por %p57_p4, %p56_p2  ;;  %p2550_p12 = scmp.lt.s32.totalorder %s2781_s16, 4 }
  0x39   : > { %p2909_p11 = por %p4122_p8, %p56_p2  ;;  %s4380_s27 = smov (%p40_p6, %s4378_s27), 0 }
  0x3a   : > { %s150_s30 = sand.u32 1, %s2761_s11   ;;  %s2113_s3 = sshll.u32 %s2777_s15, 1 }
  0x3b   : > { %s42_s4 = ssub.s32 %s2777_s15, %s4380_s27  ;;  %s2112_s6 = sshll.u32 %s150_s30, 3 }
  0x3c   : > { %s46_s5 = sor.u32 %s45_s29, %s42_s4  ;;  %s161_s20 = sadd.s32 %s2773_s14, %s2113_s3 }
  0x3d   : > { %p47_p13 = scmp.eq.s32.totalorder %s46_s5, 0  ;;  %s154_s7 = scalar_lea.vmem [#allocation2], %s2112_s6 }
  0x3e   : > { %s165_s8 = sshll.u32 %s154_s7, 4  ;;  %s2114_s18 = sshll.u32 %s161_s20, 7  ;;  %s2928_s8 = int_to_ptr.vmem [resolvable:$true] %s165_s8 }
  0x3f   : > { %s2926_s17 = scalar_select %p47_p13, %s2761_s11, %s49_s28  }
  0x40   : > { %s2933_s22 = scalar_lea.hbm %s3907_s0, %s2114_s18  ;;  %p2939_p0 = pnand %p2550_p12, %p2913_p10 }
  0x41   : > { %s151_s28 = scalar_lea.sflag [#allocation3], %s150_s30  ;;  %s2649_s3 = scalar_lea.hbm %s2933_s22, 128 }
  0x42   : > { %p2650_p3 = scmp.ne.s32.totalorder %s2933_s22, %s2649_s3  ;;  %p2651_p5 = pneg %p2939_p0 }
  0x43   : > { %s2654_s25 = scalar_lea.hbm %s3907_s0, 512  ;;  %p2655_p1 = scmp.lt.u32.totalorder %s2933_s22, %s3907_s0 }
  0x44   : > { %p2652_p7 = pnand %p2651_p5, %p2650_p3  ;;  %p2656_p2 = scmp.lt.u32.totalorder %s2654_s25, %s2649_s3 }
  0x45   : > { %p2658_p6 = scmp.lt.u32.totalorder %s2649_s3, %s2933_s22 }
  0x46   : > { %p2653_p9 = pneg %p2652_p7  ;;  %p2657_p4 = por %p2656_p2, %p2655_p1 }
  0x48   : > { %p2659_p8 = por %p2658_p6, %p2657_p4 }
  0x4a   : > { %p2660_p10 = pnand %p2659_p8, %p2653_p9 }
  0x4c   : > { %2663 = shalt.err (!%p2660_p10)
}
  0x4d   : > { %s2664_s30 = scalar_lea.vmem %s2928_s8, 128  ;;  %s2786_s6 = smov [#allocation2]  }
  0x4e   : > { %p2665_p12 = scmp.ne.s32.totalorder %s2928_s8, %s2664_s30  ;;  %s2669_s20 = sshll.u32 %s2786_s6, 4  ;;  %s2670_s20 = int_to_ptr.vmem [resolvable:$false] %s2669_s20 }
  0x4f   : > { %s2671_s7 = scalar_lea.vmem %s2670_s20, 256  ;;  %p2672_p7 = scmp.lt.s32.totalorder %s2928_s8, %s2670_s20 }
  0x50   : > { %p2667_p13 = pnand %p2665_p12, %p2651_p5  ;;  %p2673_p1 = scmp.lt.s32.totalorder %s2671_s7, %s2664_s30 }
  0x52   : > { %p2668_p3 = pneg %p2667_p13  ;;  %p2674_p2 = por %p2673_p1, %p2672_p7 }
  0x54   : > { %p2675_p4 = pnand %p2674_p2, %p2668_p3 }
  0x56   : > { %2678 = shalt.err (!%p2675_p4)
}
  0x57   : > { %2544 = dma.hbm_to_vmem [thread:$0]  (!%p2939_p0), %s2933_s22, 128, %s2928_s8, %s151_s28  }
  0x58   : > { %p4126_p9 = scmp.ne.s32.totalorder %s4118_s23, 0 }
  0x5a   : > { %174 = sbr.rel (%p4126_p9) target bundleno = 576 (0x240), region = 28 }
  0x61   : > { %s2971_s18 = sand.u32 1, %s2757_s10   ;;  %p4127_p5 = scmp.ne.s32.totalorder %s4115_s21, 0 }
  0x62   : > { %s2116_s3 = sshll.u32 %s2971_s18, 3  ;;  %s177_s1 = scalar_lea.sflag [#allocation3], %s2971_s18 }
  0x63   : > { %s2975_s24 = scalar_lea.vmem [#allocation2], %s2116_s3 }
  0x64   : > { %2740 = dma.done.wait (%p4127_p5), %s177_s1, 128  }
  0x65   : > { %2742 = vsyncadd (%p4127_p5), %s177_s1, 4294967168  ;;  %p4128_p0 = scmp.ne.s32.totalorder %s4113_s19, 0 }
  0x67   : > { %2744 = dma.done.wait (%p4128_p0), [#allocation6], 8192  }
  0x68   : > { %2746 = vsyncadd (%p4128_p0), [#allocation6], 4294959104  ;;  %v3916_v0 = vmov 0.0   ;;  %v208_v1 = vld [vmem:[#allocation5 + $0x8] sm:$0xff]  ;;  %v210_v3 = vld [vmem:[#allocation5 + $0x18] sm:$0xff]  ;;  %s2118_s19 = sshll.u32 %s2971_s18, 5 }
  0x69   : > { %367 = vmatprep.mubr.f32.mxu0 %v3916_v0  ;;  %1222 = vmatprep.mubr.f32.mxu1 %v3916_v0  ;;  %v212_v2 = vld [vmem:[#allocation5 + $0x28] sm:$0xff]  ;;  %v271_v4 = vand.u32 4294901760, %v208_v1  ;;  %v214_v6 = vld [vmem:[#allocation5 + $0x38] sm:$0xff]  ;;  %v1126_v7 = vand.u32 4294901760, %v210_v3  ;;  %v207_v8 = vld [vmem:[#allocation5] sm:$0xff]  ;;  %s2120_s21 = sshll.u32 %s2765_s12, 2 }
  0x6a   : > { %v275_v5 = vand.u32 4294901760, %v212_v2  ;;  %v211_v9 = vld [vmem:[#allocation5 + $0x20] sm:$0xff]  ;;  %v1130_v10 = vand.u32 4294901760, %v214_v6  ;;  %v273_v11 = vand.u32 4294901760, %v207_v8  ;;  %v209_v13 = vld [vmem:[#allocation5 + $0x10] sm:$0xff]  ;;  %v216_v15 = vld [vmem:[#allocation5 + $0x48] sm:$0xff] }
  0x6b   : > { %v277_v12 = vand.u32 4294901760, %v211_v9  ;;  %v213_v14 = vld [vmem:[#allocation5 + $0x30] sm:$0xff]  ;;  %v2989_v17 = vsub.f32 %v208_v1, %v271_v4  ;;  %v2993_v19 = vsub.f32 %v210_v3, %v1126_v7  ;;  %v220_v20 = vld [vmem:[#allocation5 + $0x68] sm:$0xff]  ;;  %v218_v21 = vld [vmem:[#allocation5 + $0x58] sm:$0xff]  ;;  %v1128_v29 = vand.u32 4294901760, %v209_v13  ;;  %s2121_s22 = sshll.u32 %s2769_s13, 4 }
  0x6c   : > { %v2987_v16 = vpack.c.bf16 %v275_v5, %v271_v4  ;;  %v2991_v18 = vsub.f32 %v212_v2, %v275_v5  ;;  %v222_v22 = vld [vmem:[#allocation5 + $0x78] sm:$0xff]  ;;  %v2995_v23 = vpack.c.bf16 %v1130_v10, %v1126_v7  ;;  %v2997_v24 = vsub.f32 %v214_v6, %v1130_v10  ;;  %v215_v27 = vld [vmem:[#allocation5 + $0x40] sm:$0xff]  ;;  %v217_v37 = vld [vmem:[#allocation5 + $0x50] sm:$0xff]  ;;  %s2000_s23 = sadd.s32 %s2121_s22, %s2120_s21  ;;  %s204_s8 = scalar_lea.vmem [#allocation7], %s2118_s19 }
  0x6d   : > { %4130 = vst [vmem:[#allocation14_spill] sm:$0xff] %v2989_v17  ;;  %4132 = vst [vmem:[#allocation16_spill] sm:$0xff] %v2993_v19  ;;  %v2999_v25 = vpack.c.bf16 %v277_v12, %v273_v11  ;;  %v3001_v26 = vsub.f32 %v207_v8, %v273_v11  ;;  %v3004_v28 = vsub.f32 %v211_v9, %v277_v12  ;;  %v1132_v30 = vand.u32 4294901760, %v213_v14  ;;  %v219_v32 = vld [vmem:[#allocation5 + $0x60] sm:$0xff]  ;;  %v221_v38 = vld [vmem:[#allocation5 + $0x70] sm:$0xff]  ;;  %s2004_s29 = sshll.u32 %s204_s8, 4  ;;  %s3850_s29 = int_to_ptr.vmem [resolvable:$true] %s2004_s29 }
  0x6e   : > { %4129 = vst [vmem:[#allocation13_spill] sm:$0xff] %v2987_v16  ;;  %4131 = vst [vmem:[#allocation15_spill] sm:$0xff] %v2991_v18  ;;  %2126 = vmatprep.subr.bf16.mxu0 %v2987_v16  ;;  %v279_v31 = vand.u32 4294901760, %v216_v15  ;;  %2318 = vmatprep.subr.bf16.mxu1 %v2995_v23  ;;  %v283_v33 = vand.u32 4294901760, %v220_v20  ;;  %v1134_v34 = vand.u32 4294901760, %v218_v21  ;;  %v1138_v35 = vand.u32 4294901760, %v222_v22 }
  0x6f   : > { %4133 = vst [vmem:[#allocation17_spill] sm:$0xff] %v2995_v23  ;;  %4134 = vst [vmem:[#allocation18_spill] sm:$0xff] %v2997_v24  ;;  %2128 = vmatpush1.bf16.msra.mxu0 %v2999_v25  ;;  %v281_v36 = vand.u32 4294901760, %v215_v27  ;;  %v3008_v39 = vpack.c.bf16 %v1132_v30, %v1128_v29  ;;  %v3010_v40 = vsub.f32 %v209_v13, %v1128_v29  ;;  %v224_v43 = vld [vmem:[#allocation5 + $0x88] sm:$0xff]  ;;  %v226_v45 = vld [vmem:[#allocation5 + $0x98] sm:$0xff]  ;;  %v285_v52 = vand.u32 4294901760, %v219_v32 }
  0x70   : > { %4135 = vst [vmem:[#allocation19_spill] sm:$0xff] %v2999_v25  ;;  %4136 = vst [vmem:[#allocation20_spill] sm:$0xff] %v3004_v28  ;;  %v3012_v41 = vsub.f32 %v213_v14, %v1132_v30  ;;  %v3014_v42 = vsub.f32 %v216_v15, %v279_v31  ;;  %v228_v44 = vld [vmem:[#allocation5 + $0xa8] sm:$0xff]  ;;  %v3016_v46 = vpack.c.bf16 %v283_v33, %v279_v31  ;;  %v230_v50 = vld [vmem:[#allocation5 + $0xb8] sm:$0xff]  ;;  %v1136_v54 = vand.u32 4294901760, %v217_v37  ;;  %s2122_s28 = sshll.u32 %s2000_s23, 7 }
  0x71   : > { %4137 = vst [vmem:[#allocation21_spill] sm:$0xff] %v3008_v39  ;;  %v3018_v47 = vsub.f32 %v220_v20, %v283_v33  ;;  %v3020_v48 = vpack.c.bf16 %v1138_v35, %v1134_v34  ;;  %v3022_v49 = vsub.f32 %v218_v21, %v1134_v34  ;;  %2320 = vmatpush1.bf16.msra.mxu1 %v3008_v39  ;;  %v1140_v55 = vand.u32 4294901760, %v221_v38  ;;  %v223_v59 = vld [vmem:[#allocation5 + $0x80] sm:$0xff]  ;;  %v225_v2 = vld [vmem:[#allocation5 + $0x90] sm:$0xff]  ;;  %v232_v4 = vld [vmem:[#allocation5 + $0xc8] sm:$0xff]  ;;  %s3855_s12 = scalar_lea.hbm %s3909_s2, %s2122_s28  ;;  %s1986_s13 = scalar_lea.sflag [#allocation4], %s2971_s18 }
  0x72   : > { %4138 = vst [vmem:[#allocation22_spill] sm:$0xff] %v3016_v46  ;;  %v3025_v51 = vsub.f32 %v222_v22, %v1138_v35  ;;  %v3027_v53 = vsub.f32 %v215_v27, %v281_v36  ;;  %2130 = vmatprep.subr.bf16.mxu0 %v3016_v46  ;;  %v287_v56 = vand.u32 4294901760, %v224_v43  ;;  %v291_v57 = vand.u32 4294901760, %v228_v44  ;;  %v227_v60 = vld [vmem:[#allocation5 + $0xa0] sm:$0xff]  ;;  %v229_v3 = vld [vmem:[#allocation5 + $0xb0] sm:$0xff]  ;;  %v236_v9 = vld [vmem:[#allocation5 + $0xe8] sm:$0xff] }
  0x73   : > { %4139 = vst [vmem:[#allocation23_spill] sm:$0xff] %v3020_v48  ;;  %2322 = vmatprep.subr.bf16.mxu1 %v3020_v48  ;;  %v1142_v58 = vand.u32 4294901760, %v226_v45  ;;  %v3031_v61 = vpack.c.bf16 %v285_v52, %v281_v36  ;;  %v3033_v62 = vsub.f32 %v219_v32, %v285_v52  ;;  %v3035_v63 = vsub.f32 %v217_v37, %v1136_v54  ;;  %v234_v10 = vld [vmem:[#allocation5 + $0xd8] sm:$0xff]  ;;  %v231_v33 = vld [vmem:[#allocation5 + $0xc0] sm:$0xff]  ;;  %v249_v39 = vld [vmem:[#allocation5 + $0x150] sm:$0xff]  ;;  %s2679_s5 = scalar_lea.vmem %s3850_s29, 512 }
  0x74   : > { %v1146_v1 = vand.u32 4294901760, %v230_v50  ;;  %v3037_v5 = vpack.c.bf16 %v1140_v55, %v1136_v54  ;;  %v3039_v6 = vsub.f32 %v221_v38, %v1140_v55  ;;  %v3041_v7 = vpack.c.bf16 %v291_v57, %v287_v56  ;;  %v238_v11 = vld [vmem:[#allocation5 + $0xf8] sm:$0xff]  ;;  %v235_v38 = vld [vmem:[#allocation5 + $0xe0] sm:$0xff]  ;;  %v240_v55 = vld [vmem:[#allocation5 + $0x108] sm:$0xff]  ;;  %p2680_p6 = scmp.ne.s32.totalorder %s3850_s29, %s2679_s5  ;;  %s2788_s30 = smov [#allocation7]  }
  0x75   : > { %4140 = vst [vmem:[#allocation24_spill] sm:$0xff] %v3031_v61  ;;  %v3043_v8 = vsub.f32 %v224_v43, %v287_v56  ;;  %2132 = vmatpush1.bf16.msra.mxu0 %v3031_v61  ;;  %v3046_v12 = vsub.f32 %v228_v44, %v291_v57  ;;  %v3050_v14 = vsub.f32 %v226_v45, %v1142_v58  ;;  %v289_v20 = vand.u32 4294901760, %v223_v59  ;;  %v233_v43 = vld [vmem:[#allocation5 + $0xd0] sm:$0xff]  ;;  %v244_v56 = vld [vmem:[#allocation5 + $0x128] sm:$0xff]  ;;  %v242_v57 = vld [vmem:[#allocation5 + $0x118] sm:$0xff]  ;;  %s2683_s6 = sshll.u32 %s2788_s30, 4  ;;  %s2684_s6 = int_to_ptr.vmem [resolvable:$false] %s2683_s6 }
  0x76   : > { %4141 = vst [vmem:[#allocation25_spill] sm:$0xff] %v3037_v5  ;;  %4142 = vst [vmem:[#allocation26_spill] sm:$0xff] %v3041_v7  ;;  %v3048_v13 = vpack.c.bf16 %v1146_v1, %v1142_v58  ;;  %v3052_v15 = vsub.f32 %v230_v50, %v1146_v1  ;;  %2324 = vmatpush1.bf16.msra.mxu1 %v3037_v5  ;;  %2134 = vmatprep.subr.bf16.mxu0 %v3041_v7  ;;  %v293_v21 = vand.u32 4294901760, %v227_v60  ;;  %v237_v44 = vld [vmem:[#allocation5 + $0xf0] sm:$0xff]  ;;  %v243_v0 = vld [vmem:[#allocation5 + $0x120] sm:$0xff]  ;;  %p2681_p8 = pnand %p2680_p6, %p2909_p11  ;;  %s2685_s20 = scalar_lea.vmem %s2684_s6, 1024 }
  0x77   : > { %v1144_v22 = vand.u32 4294901760, %v225_v2  ;;  %v1148_v27 = vand.u32 4294901760, %v229_v3  ;;  %v295_v29 = vand.u32 4294901760, %v232_v4  ;;  %v299_v30 = vand.u32 4294901760, %v236_v9  ;;  %v250_v48 = vld [vmem:[#allocation5 + $0x158] sm:$0xff]  ;;  %v253_v16 = vld [vmem:[#allocation5 + $0x170] sm:$0xff]  ;;  %p2686_p12 = scmp.lt.s32.totalorder %s3850_s29, %s2684_s6  ;;  %p2687_p13 = scmp.lt.s32.totalorder %s2685_s20, %s2679_s5 }
  0x78   : > { %4143 = vst [vmem:[#allocation27_spill] sm:$0xff] %v3048_v13  ;;  %2326 = vmatprep.subr.bf16.mxu1 %v3048_v13  ;;  %v1150_v31 = vand.u32 4294901760, %v234_v10  ;;  %v1154_v32 = vand.u32 4294901760, %v238_v11  ;;  %v3057_v34 = vpack.c.bf16 %v293_v21, %v289_v20  ;;  %v3059_v35 = vsub.f32 %v223_v59, %v289_v20  ;;  %v252_v13 = vld [vmem:[#allocation5 + $0x168] sm:$0xff]  ;;  %p2682_p10 = pneg %p2681_p8 }
  0x79   : > { %v3061_v36 = vsub.f32 %v227_v60, %v293_v21  ;;  %v3063_v37 = vpack.c.bf16 %v1148_v27, %v1144_v22  ;;  %v3065_v45 = vsub.f32 %v225_v2, %v1144_v22  ;;  %v3067_v50 = vsub.f32 %v229_v3, %v1148_v27  ;;  %v246_v21 = vld [vmem:[#allocation5 + $0x138] sm:$0xff]  ;;  %p2688_p3 = por %p2687_p13, %p2686_p12 }
  0x7a   : > { %4144 = vst [vmem:[#allocation28_spill] sm:$0xff] %v3057_v34  ;;  %v3069_v52 = vpack.c.bf16 %v299_v30, %v295_v29  ;;  %v3071_v54 = vsub.f32 %v232_v4, %v295_v29  ;;  %2136 = vmatpush1.bf16.msra.mxu0 %v3057_v34  ;;  %v3075_v58 = vsub.f32 %v236_v9, %v299_v30  ;;  %v297_v1 = vand.u32 4294901760, %v231_v33  ;;  %v239_v30 = vld [vmem:[#allocation5 + $0x100] sm:$0xff]  ;;  %v248_v34 = vld [vmem:[#allocation5 + $0x148] sm:$0xff] }
  0x7b   : > { %4145 = vst [vmem:[#allocation29_spill] sm:$0xff] %v3063_v37  ;;  %2328 = vmatpush1.bf16.msra.mxu1 %v3063_v37  ;;  %v3077_v59 = vpack.c.bf16 %v1154_v32, %v1150_v31  ;;  %v3079_v60 = vsub.f32 %v234_v10, %v1150_v31  ;;  %v3082_v2 = vsub.f32 %v238_v11, %v1154_v32  ;;  %v301_v3 = vand.u32 4294901760, %v235_v38  ;;  %v241_v10 = vld [vmem:[#allocation5 + $0x110] sm:$0xff]  ;;  %p2689_p7 = pnand %p2688_p3, %p2682_p10 }
  0x7c   : > { %4146 = vst [vmem:[#allocation30_spill] sm:$0xff] %v3069_v52  ;;  %2138 = vmatprep.subr.bf16.mxu0 %v3069_v52  ;;  %v1152_v4 = vand.u32 4294901760, %v233_v43  ;;  %v1156_v20 = vand.u32 4294901760, %v237_v44  ;;  %v3085_v22 = vsub.f32 %v231_v33, %v297_v1  ;;  %v303_v27 = vand.u32 4294901760, %v240_v55  ;;  %v245_v52 = vld [vmem:[#allocation5 + $0x130] sm:$0xff] }
  0x7d   : > { %4147 = vst [vmem:[#allocation31_spill] sm:$0xff] %v3077_v59  ;;  %2330 = vmatprep.subr.bf16.mxu1 %v3077_v59  ;;  %v307_v9 = vand.u32 4294901760, %v244_v56  ;;  %v1158_v29 = vand.u32 4294901760, %v242_v57  ;;  %v3087_v31 = vpack.c.bf16 %v301_v3, %v297_v1  ;;  %v3089_v37 = vsub.f32 %v235_v38, %v301_v3 }
  0x7e   : > { %v3091_v11 = vpack.c.bf16 %v1156_v20, %v1152_v4  ;;  %v3093_v32 = vsub.f32 %v233_v43, %v1152_v4  ;;  %v3095_v59 = vsub.f32 %v237_v44, %v1156_v20  ;;  %v3099_v5 = vsub.f32 %v240_v55, %v303_v27  ;;  %v254_v55 = vld [vmem:[#allocation5 + $0x178] sm:$0xff] }
  0x7f   : > { %4148 = vst [vmem:[#allocation32_spill] sm:$0xff] %v3087_v31  ;;  %v3097_v33 = vpack.c.bf16 %v307_v9, %v303_v27  ;;  %v3101_v7 = vsub.f32 %v244_v56, %v307_v9  ;;  %2140 = vmatpush1.bf16.msra.mxu0 %v3087_v31  ;;  %v1162_v38 = vand.u32 4294901760, %v246_v21  ;;  %v3105_v1 = vsub.f32 %v242_v57, %v1158_v29  ;;  %v247_v57 = vld [vmem:[#allocation5 + $0x140] sm:$0xff] }
  0x80   : > { %4149 = vst [vmem:[#allocation33_spill] sm:$0xff] %v3091_v11  ;;  %4150 = vst [vmem:[#allocation34_spill] sm:$0xff] %v3093_v32  ;;  %2332 = vmatpush1.bf16.msra.mxu1 %v3091_v11  ;;  %v305_v43 = vand.u32 4294901760, %v239_v30  ;;  %v309_v3 = vand.u32 4294901760, %v243_v0  ;;  %v1160_v4 = vand.u32 4294901760, %v241_v10  ;;  %v1164_v44 = vand.u32 4294901760, %v245_v52 }
  0x81   : > { %4151 = vst [vmem:[#allocation35_spill] sm:$0xff] %v3095_v59  ;;  %4152 = vst [vmem:[#allocation36_spill] sm:$0xff] %v3097_v33  ;;  %2142 = vmatprep.subr.bf16.mxu0 %v3097_v33  ;;  %v311_v20 = vand.u32 4294901760, %v248_v34  ;;  %v315_v61 = vand.u32 4294901760, %v252_v13  ;;  %v3108_v27 = vpack.c.bf16 %v1162_v38, %v1158_v29  ;;  %v3110_v56 = vsub.f32 %v246_v21, %v1162_v38  ;;  %v251_v31 = vld [vmem:[#allocation5 + $0x160] sm:$0xff]  ;;  %v256_v29 = vld [vmem:[#allocation5 + $0x188] sm:$0xff] }
  0x82   : > { %4153 = vst [vmem:[#allocation37_spill] sm:$0xff] %v3099_v5  ;;  %4154 = vst [vmem:[#allocation38_spill] sm:$0xff] %v3101_v7  ;;  %v3112_v9 = vpack.c.bf16 %v309_v3, %v305_v43  ;;  %v3114_v11 = vsub.f32 %v239_v30, %v305_v43  ;;  %v3116_v46 = vsub.f32 %v243_v0, %v309_v3  ;;  %v1166_v0 = vand.u32 4294901760, %v250_v48 }
  0x83   : > { %4155 = vst [vmem:[#allocation39_spill] sm:$0xff] %v3105_v1  ;;  %4156 = vst [vmem:[#allocation40_spill] sm:$0xff] %v3108_v27  ;;  %v3118_v33 = vpack.c.bf16 %v1164_v44, %v1160_v4  ;;  %v3120_v25 = vsub.f32 %v241_v10, %v1160_v4  ;;  %v3122_v23 = vsub.f32 %v245_v52, %v1164_v44  ;;  %v260_v1 = vld [vmem:[#allocation5 + $0x1a8] sm:$0xff]  ;;  %2334 = vmatprep.subr.bf16.mxu1 %v3108_v27 }
  0x84   : > { %4157 = vst [vmem:[#allocation41_spill] sm:$0xff] %v3110_v56  ;;  %4158 = vst [vmem:[#allocation42_spill] sm:$0xff] %v3112_v9  ;;  %2144 = vmatpush1.bf16.msra.mxu0 %v3112_v9  ;;  %v3126_v21 = vpack.c.bf16 %v315_v61, %v311_v20  ;;  %v3128_v30 = vsub.f32 %v248_v34, %v311_v20  ;;  %v3130_v38 = vsub.f32 %v252_v13, %v315_v61  ;;  %v268_v56 = vld [vmem:[#allocation5 + $0x1e8] sm:$0xff] }
  0x85   : > { %4159 = vst [vmem:[#allocation43_spill] sm:$0xff] %v3114_v11  ;;  %4160 = vst [vmem:[#allocation44_spill] sm:$0xff] %v3116_v46  ;;  %2336 = vmatpush1.bf16.msra.mxu1 %v3118_v33  ;;  %v1170_v10 = vand.u32 4294901760, %v254_v55  ;;  %v313_v43 = vand.u32 4294901760, %v247_v57  ;;  %v317_v52 = vand.u32 4294901760, %v251_v31  ;;  %v1168_v3 = vand.u32 4294901760, %v249_v39 }
  0x86   : > { %4161 = vst [vmem:[#allocation45_spill] sm:$0xff] %v3118_v33  ;;  %4162 = vst [vmem:[#allocation46_spill] sm:$0xff] %v3120_v25  ;;  %2146 = vmatprep.subr.bf16.mxu0 %v3126_v21  ;;  %v3134_v4 = vsub.f32 %v250_v48, %v1166_v0  ;;  %v1172_v44 = vand.u32 4294901760, %v253_v16  ;;  %v319_v27 = vand.u32 4294901760, %v256_v29  ;;  %v323_v9 = vand.u32 4294901760, %v260_v1  ;;  %v262_v25 = vld [vmem:[#allocation5 + $0x1b8] sm:$0xff] }
  0x87   : > { %4163 = vst [vmem:[#allocation47_spill] sm:$0xff] %v3122_v23  ;;  %4164 = vst [vmem:[#allocation48_spill] sm:$0xff] %v3126_v21  ;;  %v258_v23 = vld [vmem:[#allocation5 + $0x198] sm:$0xff]  ;;  %v3136_v34 = vpack.c.bf16 %v1170_v10, %v1166_v0  ;;  %v3138_v61 = vsub.f32 %v254_v55, %v1170_v10  ;;  %v3140_v13 = vpack.c.bf16 %v317_v52, %v313_v43  ;;  %v255_v33 = vld [vmem:[#allocation5 + $0x180] sm:$0xff] }
  0x88   : > { %4165 = vst [vmem:[#allocation49_spill] sm:$0xff] %v3128_v30  ;;  %4166 = vst [vmem:[#allocation50_spill] sm:$0xff] %v3130_v38  ;;  %v3142_v20 = vsub.f32 %v247_v57, %v313_v43  ;;  %v259_v38 = vld [vmem:[#allocation5 + $0x1a0] sm:$0xff]  ;;  %v257_v30 = vld [vmem:[#allocation5 + $0x190] sm:$0xff]  ;;  %v3144_v46 = vsub.f32 %v251_v31, %v317_v52  ;;  %v3146_v48 = vpack.c.bf16 %v1172_v44, %v1168_v3  ;;  %v1174_v31 = vand.u32 4294901760, %v258_v23 }
  0x89   : > { %4167 = vst [vmem:[#allocation51_spill] sm:$0xff] %v3134_v4  ;;  %4168 = vst [vmem:[#allocation52_spill] sm:$0xff] %v3136_v34  ;;  %v3148_v21 = vsub.f32 %v249_v39, %v1168_v3  ;;  %v3150_v4 = vsub.f32 %v253_v16, %v1172_v44  ;;  %v261_v11 = vld [vmem:[#allocation5 + $0x1b0] sm:$0xff]  ;;  %v264_v0 = vld [vmem:[#allocation5 + $0x1c8] sm:$0xff]  ;;  %2338 = vmatprep.subr.bf16.mxu1 %v3136_v34  ;;  %2148 = vmatpush1.bf16.msra.mxu0 %v3140_v13  ;;  %v1178_v39 = vand.u32 4294901760, %v262_v25 }
  0x8a   : > { %4169 = vst [vmem:[#allocation53_spill] sm:$0xff] %v3138_v61  ;;  %4170 = vst [vmem:[#allocation54_spill] sm:$0xff] %v3140_v13  ;;  %v3154_v55 = vpack.c.bf16 %v323_v9, %v319_v27  ;;  %v3156_v57 = vsub.f32 %v256_v29, %v319_v27  ;;  %v3158_v10 = vsub.f32 %v260_v1, %v323_v9  ;;  %2340 = vmatpush1.bf16.msra.mxu1 %v3146_v48 }
  0x8b   : > { %4171 = vst [vmem:[#allocation55_spill] sm:$0xff] %v3142_v20  ;;  %4172 = vst [vmem:[#allocation56_spill] sm:$0xff] %v3144_v46  ;;  %v321_v43 = vand.u32 4294901760, %v255_v33  ;;  %v325_v16 = vand.u32 4294901760, %v259_v38  ;;  %v1176_v52 = vand.u32 4294901760, %v257_v30  ;;  %v3162_v3 = vsub.f32 %v258_v23, %v1174_v31  ;;  %v269_v20 = vld [vmem:[#allocation5 + $0x1f0] sm:$0xff] }
  0x8c   : > { %4173 = vst [vmem:[#allocation57_spill] sm:$0xff] %v3146_v48  ;;  %4174 = vst [vmem:[#allocation58_spill] sm:$0xff] %v3148_v21  ;;  %2150 = vmatprep.subr.bf16.mxu0 %v3154_v55  ;;  %v1180_v44 = vand.u32 4294901760, %v261_v11  ;;  %v327_v34 = vand.u32 4294901760, %v264_v0  ;;  %v331_v13 = vand.u32 4294901760, %v268_v56  ;;  %v270_v21 = vld [vmem:[#allocation5 + $0x1f8] sm:$0xff]  ;;  %v3164_v27 = vpack.c.bf16 %v1178_v39, %v1174_v31 }
  0x8d   : > { %4175 = vst [vmem:[#allocation59_spill] sm:$0xff] %v3150_v4  ;;  %4176 = vst [vmem:[#allocation60_spill] sm:$0xff] %v3154_v55  ;;  %v266_v4 = vld [vmem:[#allocation5 + $0x1d8] sm:$0xff]  ;;  %v3166_v1 = vsub.f32 %v262_v25, %v1178_v39  ;;  %v3168_v9 = vpack.c.bf16 %v325_v16, %v321_v43  ;;  %v3170_v29 = vsub.f32 %v255_v33, %v321_v43  ;;  %v263_v48 = vld [vmem:[#allocation5 + $0x1c0] sm:$0xff]  ;;  %v1186_v39 = vand.u32 4294901760, %v270_v21 }
  0x8e   : > { %4177 = vst [vmem:[#allocation61_spill] sm:$0xff] %v3156_v57  ;;  %4178 = vst [vmem:[#allocation62_spill] sm:$0xff] %v3158_v10  ;;  %v267_v10 = vld [vmem:[#allocation5 + $0x1e0] sm:$0xff]  ;;  %v265_v57 = vld [vmem:[#allocation5 + $0x1d0] sm:$0xff]  ;;  %v3172_v46 = vsub.f32 %v259_v38, %v325_v16  ;;  %v3174_v23 = vpack.c.bf16 %v1180_v44, %v1176_v52  ;;  %v3176_v55 = vsub.f32 %v257_v30, %v1176_v52  ;;  %2342 = vmatprep.subr.bf16.mxu1 %v3164_v27 }
  0x8f   : > { %4179 = vst [vmem:[#allocation63_spill] sm:$0xff] %v3162_v3  ;;  %4180 = vst [vmem:[#allocation64_spill] sm:$0xff] %v3164_v27  ;;  %v3178_v3 = vsub.f32 %v261_v11, %v1180_v44  ;;  %2152 = vmatpush1.bf16.msra.mxu0 %v3168_v9  ;;  %v3182_v25 = vpack.c.bf16 %v331_v13, %v327_v34  ;;  %v3184_v33 = vsub.f32 %v264_v0, %v327_v34 }
  0x90   : > { %4181 = vst [vmem:[#allocation65_spill] sm:$0xff] %v3168_v9  ;;  %4182 = vst [vmem:[#allocation66_spill] sm:$0xff] %v3174_v23  ;;  %v3186_v31 = vsub.f32 %v268_v56, %v331_v13  ;;  %v1182_v38 = vand.u32 4294901760, %v266_v4  ;;  %2344 = vmatpush1.bf16.msra.mxu1 %v3174_v23  ;;  %v329_v30 = vand.u32 4294901760, %v263_v48  ;;  %v333_v43 = vand.u32 4294901760, %v267_v10  ;;  %v206_v9 = vld [vmem:[%s2975_s24] sm:$0xff] }
  0x91   : > { %4183 = vst [vmem:[#allocation67_spill] sm:$0xff] %v3182_v25  ;;  %v1184_v11 = vand.u32 4294901760, %v265_v57  ;;  %2154 = vmatprep.subr.bf16.mxu0 %v3182_v25  ;;  %v1188_v52 = vand.u32 4294901760, %v269_v20  ;;  %v3994_v44 = vand.u32 4294901760, %v2989_v17  ;;  %v3993_v34 = vand.u32 4294901760, %v2991_v18 }
  0x92   : > { %4184 = vst [vmem:[#allocation68_spill] sm:$0xff] %v3186_v31  ;;  %v3190_v16 = vsub.f32 %v266_v4, %v1182_v38  ;;  %v3194_v0 = vpack.c.bf16 %v1186_v39, %v1182_v38  ;;  %v3196_v56 = vsub.f32 %v270_v21, %v1186_v39  ;;  %v3198_v13 = vpack.c.bf16 %v333_v43, %v329_v30 }
  0x93   : > { %v3200_v23 = vsub.f32 %v263_v48, %v329_v30  ;;  %v3203_v27 = vsub.f32 %v267_v10, %v333_v43  ;;  %v3205_v31 = vpack.c.bf16 %v1188_v52, %v1184_v11  ;;  %v3207_v4 = vsub.f32 %v265_v57, %v1184_v11 }
  0x94   : > { %4185 = vst [vmem:[#allocation69_spill] sm:$0xff] %v3190_v16  ;;  %4186 = vst [vmem:[#allocation70_spill] sm:$0xff] %v3194_v0  ;;  %v3209_v25 = vsub.f32 %v269_v20, %v1188_v52  ;;  %2346 = vmatprep.subr.bf16.mxu1 %v3194_v0  ;;  %2156 = vmatpush1.bf16.msra.mxu0 %v3198_v13  ;;  %v382_v21 = vsub.f32 %v2989_v17, %v3994_v44  ;;  %v3997_v10 = vand.u32 4294901760, %v2993_v19 }
  0x95   : > { %4187 = vst [vmem:[#allocation71_spill] sm:$0xff] %v3196_v56  ;;  %4188 = vst [vmem:[#allocation72_spill] sm:$0xff] %v3198_v13  ;;  %v394_v48 = vsub.f32 %v2991_v18, %v3993_v34  ;;  %v4002_v38 = vand.u32 4294901760, %v2997_v24  ;;  %2348 = vmatpush1.bf16.msra.mxu1 %v3205_v31  ;;  %v3222_v20 = vand.u32 4294901760, %v206_v9  ;;  %v4009_v57 = vand.u32 4294901760, %v3001_v26 }
  0x96   : > { %4189 = vst [vmem:[#allocation73_spill] sm:$0xff] %v3200_v23  ;;  %4190 = vst [vmem:[#allocation74_spill] sm:$0xff] %v3203_v27  ;;  %v4010_v39 = vand.u32 4294901760, %v3004_v28  ;;  %v4016_v30 = vand.u32 4294901760, %v3010_v40  ;;  %v383_v43 = vand.u32 4294901760, %v382_v21  ;;  %v1237_v52 = vsub.f32 %v2993_v19, %v3997_v10 }
  0x97   : > { %4191 = vst [vmem:[#allocation75_spill] sm:$0xff] %v3205_v31  ;;  %4192 = vst [vmem:[#allocation76_spill] sm:$0xff] %v3207_v4  ;;  %v395_v11 = vand.u32 4294901760, %v394_v48  ;;  %v1249_v34 = vsub.f32 %v2997_v24, %v4002_v38  ;;  %v3234_v44 = vsub.f32 %v206_v9, %v3222_v20  ;;  %v388_v31 = vsub.f32 %v3001_v26, %v4009_v57 }
  0x98   : > { %4193 = vst [vmem:[#allocation77_spill] sm:$0xff] %v3209_v25  ;;  %4194 = vst [vmem:[#allocation78_spill] sm:$0xff] %v3222_v20  ;;  %v400_v21 = vsub.f32 %v3004_v28, %v4010_v39  ;;  %v1243_v48 = vsub.f32 %v3010_v40, %v4016_v30  ;;  %v1238_v13 = vand.u32 4294901760, %v1237_v52  ;;  %v4013_v38 = vand.u32 4294901760, %v3012_v41 }
  0x99   : > { %4195 = vst [vmem:[#allocation79_spill] sm:$0xff] %v3234_v44  ;;  %v2157_v10 = vpack.c.bf16 %v395_v11, %v383_v43  ;;  %v1250_v0 = vand.u32 4294901760, %v1249_v34  ;;  %v3247_v9 = vand.u32 4294901760, %v3234_v44  ;;  %v389_v20 = vand.u32 4294901760, %v388_v31 }
  0x9a   : > { %v401_v24 = vand.u32 4294901760, %v400_v21  ;;  %v1244_v19 = vand.u32 4294901760, %v1243_v48  ;;  %v1255_v39 = vsub.f32 %v3012_v41, %v4013_v38  ;;  %v4014_v28 = vand.u32 4294901760, %v3014_v42 }
  0x9b   : > { %4196 = vst [vmem:[#allocation80_spill] sm:$0xff] %v3247_v9  ;;  %2158 = vmatprep.subr.bf16.mxu0 %v2157_v10  ;;  %v2349_v57 = vpack.c.bf16 %v1250_v0, %v1238_v13  ;;  %v4015_v43 = vand.u32 4294901760, %v3018_v47  ;;  %v371_v34 = vsub.f32 %v3234_v44, %v3247_v9  ;;  %v4017_v52 = vand.u32 4294901760, %v3022_v49 }
  0x9c   : > { %v2159_v11 = vpack.c.bf16 %v401_v24, %v389_v20  ;;  %v4020_v31 = vand.u32 4294901760, %v3025_v51  ;;  %v1256_v21 = vand.u32 4294901760, %v1255_v39  ;;  %v406_v0 = vsub.f32 %v3014_v42, %v4014_v28 }
  0x9d   : > { %2350 = vmatprep.subr.bf16.mxu1 %v2349_v57  ;;  %v418_v13 = vsub.f32 %v3018_v47, %v4015_v43  ;;  %v4021_v10 = vand.u32 4294901760, %v3027_v53  ;;  %v372_v48 = vand.u32 4294901760, %v371_v34  ;;  %v1261_v24 = vsub.f32 %v3022_v49, %v4017_v52 }
  0x9e   : > { %v1273_v20 = vsub.f32 %v3025_v51, %v4020_v31  ;;  %v4026_v57 = vand.u32 4294901760, %v3033_v62  ;;  %v2351_v39 = vpack.c.bf16 %v1256_v21, %v1244_v19  ;;  %v407_v38 = vand.u32 4294901760, %v406_v0 }
  0x9f   : > { %v419_v28 = vand.u32 4294901760, %v418_v13  ;;  %v412_v43 = vsub.f32 %v3027_v53, %v4021_v10  ;;  %373 = vmatmul.mubr.f32.vlgmr.msra.gmra.mrb[0].mxu0 %v372_v48  ;;  %1228 = vmatmul.mubr.f32.vlgmr.msra.gmra.mrb[0].mxu1 %v372_v48  ;;  %v1262_v34 = vand.u32 4294901760, %v1261_v24  ;;  %v4022_v9 = vand.u32 4294901760, %v3035_v63 }
  0xa0   : > { %v1274_v30 = vand.u32 4294901760, %v1273_v20  ;;  %v424_v52 = vsub.f32 %v3033_v62, %v4026_v57  ;;  %2160 = vmatpush1.bf16.msra.mxu0 %v2159_v11  ;;  %2352 = vmatpush1.bf16.msra.mxu1 %v2351_v39  ;;  %v4023_v21 = vand.u32 4294901760, %v3039_v6  ;;  %v4024_v0 = vand.u32 4294901760, %v3043_v8 }
  0xa1   : > { %v2161_v31 = vpack.c.bf16 %v419_v28, %v407_v38  ;;  %v413_v19 = vand.u32 4294901760, %v412_v43  ;;  %v1267_v48 = vsub.f32 %v3035_v63, %v4022_v9  ;;  %v4025_v24 = vand.u32 4294901760, %v3046_v12 }
  0xa2   : > { %v2353_v13 = vpack.c.bf16 %v1274_v30, %v1262_v34  ;;  %v425_v10 = vand.u32 4294901760, %v424_v52  ;;  %v4197_v20 = vmov 0.0   ;;  %v1279_v28 = vsub.f32 %v3039_v6, %v4023_v21 }
  0xa3   : > { %603 = vmatprep.mubr.f32.mxu0 %v4197_v20  ;;  %1458 = vmatprep.mubr.f32.mxu1 %v4197_v20  ;;  %v430_v38 = vsub.f32 %v3043_v8, %v4024_v0  ;;  %v4027_v30 = vand.u32 4294901760, %v3050_v14  ;;  %v4038_v43 = vand.u32 4294901760, %v3052_v15  ;;  %v1268_v52 = vand.u32 4294901760, %v1267_v48 }
  0xa4   : > { %2162 = vmatprep.subr.bf16.mxu0 %v2161_v31  ;;  %2354 = vmatprep.subr.bf16.mxu1 %v2353_v13  ;;  %v2163_v11 = vpack.c.bf16 %v425_v10, %v413_v19  ;;  %v442_v39 = vsub.f32 %v3046_v12, %v4025_v24  ;;  %v4030_v31 = vand.u32 4294901760, %v3059_v35  ;;  %v1280_v34 = vand.u32 4294901760, %v1279_v28 }
  0xa5   : > { %v431_v9 = vand.u32 4294901760, %v430_v38  ;;  %v1285_v21 = vsub.f32 %v3050_v14, %v4027_v30  ;;  %v1297_v0 = vsub.f32 %v3052_v15, %v4038_v43  ;;  %v4031_v19 = vand.u32 4294901760, %v3061_v36 }
  0xa6   : > { %2164 = vmatpush1.bf16.msra.mxu0 %v2163_v11  ;;  %v443_v13 = vand.u32 4294901760, %v442_v39  ;;  %v436_v10 = vsub.f32 %v3059_v35, %v4030_v31  ;;  %v4035_v48 = vand.u32 4294901760, %v3065_v45  ;;  %v2355_v28 = vpack.c.bf16 %v1280_v34, %v1268_v52 }
  0xa7   : > { %v1286_v38 = vand.u32 4294901760, %v1285_v21  ;;  %v1298_v24 = vand.u32 4294901760, %v1297_v0  ;;  %v4032_v57 = vand.u32 4294901760, %v3067_v50  ;;  %v448_v11 = vsub.f32 %v3061_v36, %v4031_v19 }
  0xa8   : > { %v2165_v30 = vpack.c.bf16 %v443_v13, %v431_v9  ;;  %v437_v44 = vand.u32 4294901760, %v436_v10  ;;  %v1291_v39 = vsub.f32 %v3065_v45, %v4035_v48  ;;  %2356 = vmatpush1.bf16.msra.mxu1 %v2355_v28  ;;  %v4033_v21 = vand.u32 4294901760, %v3071_v54 }
  0xa9   : > { %v2357_v31 = vpack.c.bf16 %v1298_v24, %v1286_v38  ;;  %v1303_v52 = vsub.f32 %v3067_v50, %v4032_v57  ;;  %v4034_v0 = vand.u32 4294901760, %v3075_v58  ;;  %v449_v9 = vand.u32 4294901760, %v448_v11 }
  0xaa   : > { %2166 = vmatprep.subr.bf16.mxu0 %v2165_v30  ;;  %v1292_v34 = vand.u32 4294901760, %v1291_v39  ;;  %v4036_v13 = vand.u32 4294901760, %v3079_v60  ;;  %v4037_v10 = vand.u32 4294901760, %v3082_v2  ;;  %v454_v24 = vsub.f32 %v3071_v54, %v4033_v21 }
  0xab   : > { %2358 = vmatprep.subr.bf16.mxu1 %v2357_v31  ;;  %v1304_v19 = vand.u32 4294901760, %v1303_v52  ;;  %v466_v28 = vsub.f32 %v3075_v58, %v4034_v0  ;;  %v4041_v38 = vand.u32 4294901760, %v3085_v22  ;;  %v2167_v57 = vpack.c.bf16 %v449_v9, %v437_v44 }
  0xac   : > { %v1309_v30 = vsub.f32 %v3079_v60, %v4036_v13  ;;  %v1321_v31 = vsub.f32 %v3082_v2, %v4037_v10  ;;  %v4040_v11 = vand.u32 4294901760, %v3089_v37  ;;  %v455_v52 = vand.u32 4294901760, %v454_v24 }
  0xad   : > { %v2359_v39 = vpack.c.bf16 %v1304_v19, %v1292_v34  ;;  %v467_v21 = vand.u32 4294901760, %v466_v28  ;;  %v460_v0 = vsub.f32 %v3085_v22, %v4041_v38  ;;  %2168 = vmatpush1.bf16.msra.mxu0 %v2167_v57  ;;  %v4039_v13 = vand.u32 4294901760, %v3093_v32 }
  0xae   : > { %v1310_v48 = vand.u32 4294901760, %v1309_v30  ;;  %v1322_v44 = vand.u32 4294901760, %v1321_v31  ;;  %v472_v9 = vsub.f32 %v3089_v37, %v4040_v11  ;;  %v4044_v19 = vand.u32 4294901760, %v3095_v59 }
  0xaf   : > { %2360 = vmatpush1.bf16.msra.mxu1 %v2359_v39  ;;  %v2169_v10 = vpack.c.bf16 %v467_v21, %v455_v52  ;;  %v461_v43 = vand.u32 4294901760, %v460_v0  ;;  %v4045_v34 = vand.u32 4294901760, %v3099_v5  ;;  %v1315_v57 = vsub.f32 %v3093_v32, %v4039_v13  ;;  %v4198_v0 = vld [vmem:[#allocation39_spill] sm:$0xff]  ;;  %v4199_v52 = vld [vmem:[#allocation41_spill] sm:$0xff] }
  0xb0   : > { %v2361_v24 = vpack.c.bf16 %v1322_v44, %v1310_v48  ;;  %v473_v28 = vand.u32 4294901760, %v472_v9  ;;  %v4046_v30 = vand.u32 4294901760, %v3101_v7  ;;  %v1327_v31 = vsub.f32 %v3095_v59, %v4044_v19 }
  0xb1   : > { %2170 = vmatprep.subr.bf16.mxu0 %v2169_v10  ;;  %v478_v21 = vsub.f32 %v3099_v5, %v4045_v34  ;;  %v4054_v39 = vand.u32 4294901760, %v4198_v0  ;;  %v4057_v48 = vand.u32 4294901760, %v4199_v52  ;;  %v1316_v9 = vand.u32 4294901760, %v1315_v57  ;;  %v4200_v10 = vld [vmem:[#allocation43_spill] sm:$0xff] }
  0xb2   : > { %2362 = vmatprep.subr.bf16.mxu1 %v2361_v24  ;;  %v2171_v44 = vpack.c.bf16 %v473_v28, %v461_v43  ;;  %v490_v13 = vsub.f32 %v3101_v7, %v4046_v30  ;;  %v4056_v11 = vand.u32 4294901760, %v4200_v10  ;;  %v1328_v38 = vand.u32 4294901760, %v1327_v31  ;;  %v4201_v28 = vld [vmem:[#allocation44_spill] sm:$0xff]  ;;  %v4202_v30 = vld [vmem:[#allocation46_spill] sm:$0xff]  ;;  %v4203_v7 = vld [vmem:[#allocation47_spill] sm:$0xff] }
  0xb3   : > { %v479_v32 = vand.u32 4294901760, %v478_v21  ;;  %v1333_v19 = vsub.f32 %v4198_v0, %v4054_v39  ;;  %v1345_v34 = vsub.f32 %v4199_v52, %v4057_v48  ;;  %v4059_v57 = vand.u32 4294901760, %v4201_v28 }
  0xb4   : > { %2172 = vmatpush1.bf16.msra.mxu0 %v2171_v44  ;;  %v491_v24 = vand.u32 4294901760, %v490_v13  ;;  %v484_v43 = vsub.f32 %v4200_v10, %v4056_v11  ;;  %v4062_v59 = vand.u32 4294901760, %v4202_v30  ;;  %v2363_v31 = vpack.c.bf16 %v1328_v38, %v1316_v9  ;;  %v4205_v9 = vld [vmem:[#allocation50_spill] sm:$0xff] }
  0xb5   : > { %v1334_v21 = vand.u32 4294901760, %v1333_v19  ;;  %v1346_v20 = vand.u32 4294901760, %v1345_v34  ;;  %v4061_v5 = vand.u32 4294901760, %v4203_v7  ;;  %v496_v44 = vsub.f32 %v4201_v28, %v4059_v57  ;;  %v4204_v19 = vld [vmem:[#allocation49_spill] sm:$0xff] }
  0xb6   : > { %v2173_v39 = vpack.c.bf16 %v491_v24, %v479_v32  ;;  %v485_v0 = vand.u32 4294901760, %v484_v43  ;;  %v1339_v13 = vsub.f32 %v4202_v30, %v4062_v59  ;;  %2364 = vmatpush1.bf16.msra.mxu1 %v2363_v31  ;;  %v4064_v34 = vand.u32 4294901760, %v4204_v19  ;;  %v4206_v43 = vld [vmem:[#allocation51_spill] sm:$0xff] }
  0xb7   : > { %v2365_v11 = vpack.c.bf16 %v1346_v20, %v1334_v21  ;;  %v1351_v38 = vsub.f32 %v4203_v7, %v4061_v5  ;;  %v4065_v48 = vand.u32 4294901760, %v4205_v9  ;;  %v497_v32 = vand.u32 4294901760, %v496_v44  ;;  %v4207_v21 = vld [vmem:[#allocation55_spill] sm:$0xff]  ;;  %v4208_v44 = vld [vmem:[#allocation56_spill] sm:$0xff] }
  0xb8   : > { %2174 = vmatprep.subr.bf16.mxu0 %v2173_v39  ;;  %v1340_v24 = vand.u32 4294901760, %v1339_v13  ;;  %v4067_v10 = vand.u32 4294901760, %v4206_v43  ;;  %v4069_v57 = vand.u32 4294901760, %v3138_v61  ;;  %v502_v20 = vsub.f32 %v4204_v19, %v4064_v34  ;;  %v4210_v19 = vld [vmem:[#allocation59_spill] sm:$0xff] }
  0xb9   : > { %2366 = vmatprep.subr.bf16.mxu1 %v2365_v11  ;;  %v1352_v28 = vand.u32 4294901760, %v1351_v38  ;;  %v514_v31 = vsub.f32 %v4205_v9, %v4065_v48  ;;  %v4076_v5 = vand.u32 4294901760, %v4207_v21  ;;  %v2175_v59 = vpack.c.bf16 %v497_v32, %v485_v0 }
  0xba   : > { %v1357_v39 = vsub.f32 %v4206_v43, %v4067_v10  ;;  %v1369_v11 = vsub.f32 %v3138_v61, %v4069_v57  ;;  %v4074_v13 = vand.u32 4294901760, %v4208_v44  ;;  %v503_v7 = vand.u32 4294901760, %v502_v20  ;;  %v4209_v10 = vld [vmem:[#allocation58_spill] sm:$0xff] }
  0xbb   : > { %v2367_v38 = vpack.c.bf16 %v1352_v28, %v1340_v24  ;;  %v515_v34 = vand.u32 4294901760, %v514_v31  ;;  %v508_v48 = vsub.f32 %v4207_v21, %v4076_v5  ;;  %2176 = vmatpush1.bf16.msra.mxu0 %v2175_v59  ;;  %v4075_v43 = vand.u32 4294901760, %v4209_v10  ;;  %v4211_v24 = vld [vmem:[#allocation61_spill] sm:$0xff] }
  0xbc   : > { %v1358_v9 = vand.u32 4294901760, %v1357_v39  ;;  %v1370_v0 = vand.u32 4294901760, %v1369_v11  ;;  %v520_v32 = vsub.f32 %v4208_v44, %v4074_v13  ;;  %v4077_v28 = vand.u32 4294901760, %v4210_v19  ;;  %v4212_v39 = vld [vmem:[#allocation62_spill] sm:$0xff] }
  0xbd   : > { %2368 = vmatpush1.bf16.msra.mxu1 %v2367_v38  ;;  %v2177_v57 = vpack.c.bf16 %v515_v34, %v503_v7  ;;  %v509_v61 = vand.u32 4294901760, %v508_v48  ;;  %v4078_v20 = vand.u32 4294901760, %v4211_v24  ;;  %v1363_v59 = vsub.f32 %v4209_v10, %v4075_v43  ;;  %v4213_v48 = vld [vmem:[#allocation63_spill] sm:$0xff] }
  0xbe   : > { %v2369_v31 = vpack.c.bf16 %v1370_v0, %v1358_v9  ;;  %v521_v30 = vand.u32 4294901760, %v520_v32  ;;  %v4079_v11 = vand.u32 4294901760, %v4212_v39  ;;  %v1375_v13 = vsub.f32 %v4210_v19, %v4077_v28 }
  0xbf   : > { %2178 = vmatprep.subr.bf16.mxu0 %v2177_v57  ;;  %v526_v7 = vsub.f32 %v4211_v24, %v4078_v20  ;;  %v4081_v34 = vand.u32 4294901760, %v4213_v48  ;;  %v4085_v9 = vand.u32 4294901760, %v3166_v1  ;;  %v1364_v0 = vand.u32 4294901760, %v1363_v59 }
  0xc0   : > { %2370 = vmatprep.subr.bf16.mxu1 %v2369_v31  ;;  %v2179_v38 = vpack.c.bf16 %v521_v30, %v509_v61  ;;  %v538_v32 = vsub.f32 %v4212_v39, %v4079_v11  ;;  %v4083_v57 = vand.u32 4294901760, %v3170_v29  ;;  %v1376_v43 = vand.u32 4294901760, %v1375_v13 }
  0xc1   : > { %v527_v5 = vand.u32 4294901760, %v526_v7  ;;  %v1381_v28 = vsub.f32 %v4213_v48, %v4081_v34  ;;  %v1393_v20 = vsub.f32 %v3166_v1, %v4085_v9  ;;  %v4084_v30 = vand.u32 4294901760, %v3172_v46 }
  0xc2   : > { %2180 = vmatpush1.bf16.msra.mxu0 %v2179_v38  ;;  %v539_v31 = vand.u32 4294901760, %v538_v32  ;;  %v532_v61 = vsub.f32 %v3170_v29, %v4083_v57  ;;  %v4089_v59 = vand.u32 4294901760, %v3176_v55  ;;  %v2371_v13 = vpack.c.bf16 %v1376_v43, %v1364_v0 }
  0xc3   : > { %v1382_v7 = vand.u32 4294901760, %v1381_v28  ;;  %v1394_v11 = vand.u32 4294901760, %v1393_v20  ;;  %v4086_v39 = vand.u32 4294901760, %v3178_v3  ;;  %v544_v38 = vsub.f32 %v3172_v46, %v4084_v30  ;;  %v4214_v20 = vld [vmem:[#allocation68_spill] sm:$0xff] }
  0xc4   : > { %v2181_v34 = vpack.c.bf16 %v539_v31, %v527_v5  ;;  %v533_v48 = vand.u32 4294901760, %v532_v61  ;;  %v1387_v32 = vsub.f32 %v3176_v55, %v4089_v59  ;;  %2372 = vmatpush1.bf16.msra.mxu1 %v2371_v13  ;;  %v4087_v28 = vand.u32 4294901760, %v3184_v33 }
  0xc5   : > { %v2373_v57 = vpack.c.bf16 %v1394_v11, %v1382_v7  ;;  %v1399_v43 = vsub.f32 %v3178_v3, %v4086_v39  ;;  %v4088_v0 = vand.u32 4294901760, %v4214_v20  ;;  %v545_v5 = vand.u32 4294901760, %v544_v38 }
  0xc6   : > { %2182 = vmatprep.subr.bf16.mxu0 %v2181_v34  ;;  %v1388_v31 = vand.u32 4294901760, %v1387_v32  ;;  %v4090_v61 = vand.u32 4294901760, %v3190_v16  ;;  %v4091_v30 = vand.u32 4294901760, %v3196_v56  ;;  %v550_v11 = vsub.f32 %v3184_v33, %v4087_v28 }
  0xc7   : > { %2374 = vmatprep.subr.bf16.mxu1 %v2373_v57  ;;  %v1400_v9 = vand.u32 4294901760, %v1399_v43  ;;  %v562_v13 = vsub.f32 %v4214_v20, %v4088_v0  ;;  %v4097_v7 = vand.u32 4294901760, %v3200_v23  ;;  %v2183_v39 = vpack.c.bf16 %v545_v5, %v533_v48 }
  0xc8   : > { %v1405_v34 = vsub.f32 %v3190_v16, %v4090_v61  ;;  %v1417_v57 = vsub.f32 %v3196_v56, %v4091_v30  ;;  %v4096_v38 = vand.u32 4294901760, %v3203_v27  ;;  %v551_v43 = vand.u32 4294901760, %v550_v11 }
  0xc9   : > { %v2375_v32 = vpack.c.bf16 %v1400_v9, %v1388_v31  ;;  %v563_v28 = vand.u32 4294901760, %v562_v13  ;;  %v556_v0 = vsub.f32 %v3200_v23, %v4097_v7  ;;  %2184 = vmatpush1.bf16.msra.mxu0 %v2183_v39  ;;  %v4094_v61 = vand.u32 4294901760, %v3207_v4 }
  0xca   : > { %v1406_v59 = vand.u32 4294901760, %v1405_v34  ;;  %v1418_v48 = vand.u32 4294901760, %v1417_v57  ;;  %v568_v5 = vsub.f32 %v3203_v27, %v4096_v38  ;;  %v4095_v9 = vand.u32 4294901760, %v3209_v25  ;;  %v4220_v38 = vld [vmem:[#allocation38_spill] sm:$0xff] }
  0xcb   : > { %2376 = vmatpush1.bf16.msra.mxu1 %v2375_v32  ;;  %v2185_v30 = vpack.c.bf16 %v563_v28, %v551_v43  ;;  %v557_v56 = vand.u32 4294901760, %v556_v0  ;;  %v1411_v13 = vsub.f32 %v3207_v4, %v4094_v61  ;;  %v2189_v34 = vpack.c.bf16 %v2991_v18, %v2989_v17  ;;  %v4215_v32 = vld [vmem:[#allocation16_spill] sm:$0xff] }
  0xcc   : > { %v2377_v31 = vpack.c.bf16 %v1418_v48, %v1406_v59  ;;  %v569_v11 = vand.u32 4294901760, %v568_v5  ;;  %v1423_v39 = vsub.f32 %v3209_v25, %v4095_v9  ;;  %v4216_v59 = vld [vmem:[#allocation18_spill] sm:$0xff]  ;;  %v4217_v48 = vld [vmem:[#allocation20_spill] sm:$0xff]  ;;  %v4221_v7 = vmov 0.0  }
  0xcd   : > { %2186 = vmatprep.subr.bf16.mxu0 %v2185_v30  ;;  %v1412_v28 = vand.u32 4294901760, %v1411_v13  ;;  %v2381_v43 = vpack.c.bf16 %v4216_v59, %v4215_v32  ;;  %v2191_v5 = vpack.c.bf16 %v4217_v48, %v3001_v26  ;;  %v2193_v30 = vpack.c.bf16 %v3018_v47, %v3014_v42  ;;  %v4218_v9 = vld [vmem:[#allocation78_spill] sm:$0xff] }
  0xce   : > { %2378 = vmatprep.subr.bf16.mxu1 %v2377_v31  ;;  %v2187_v57 = vpack.c.bf16 %v569_v11, %v557_v56  ;;  %v1424_v0 = vand.u32 4294901760, %v1423_v39  ;;  %v2383_v56 = vpack.c.bf16 %v3012_v41, %v3010_v40  ;;  %v2385_v31 = vpack.c.bf16 %v3025_v51, %v3022_v49 }
  0xcf   : > { %v2195_v11 = vpack.c.bf16 %v3033_v62, %v3027_v53  ;;  %v2387_v13 = vpack.c.bf16 %v3039_v6, %v3035_v63  ;;  %v2197_v39 = vpack.c.bf16 %v3046_v12, %v3043_v8  ;;  %v4222_v18 = vand.u32 4294901760, %v4215_v32 }
  0xd0   : > { %2188 = vmatpush1.bf16.msra.mxu0 %v2187_v57  ;;  %v2379_v61 = vpack.c.bf16 %v1424_v0, %v1412_v28  ;;  %v2391_v57 = vpack.c.bf16 %v3067_v50, %v3065_v45  ;;  %v2201_v28 = vpack.c.bf16 %v3075_v58, %v3071_v54  ;;  %v2393_v0 = vpack.c.bf16 %v3082_v2, %v3079_v60 }
  0xd1   : > { %2190 = vmatprep.subr.bf16.mxu0 %v2189_v34  ;;  %v2199_v34 = vpack.c.bf16 %v3061_v36, %v3059_v35  ;;  %v4223_v17 = vand.u32 4294901760, %v4216_v59  ;;  %v4224_v4 = vand.u32 4294901760, %v3001_v26  ;;  %v4226_v23 = vand.u32 4294901760, %v3010_v40 }
  0xd2   : > { %2380 = vmatpush1.bf16.msra.mxu1 %v2379_v61  ;;  %v2389_v61 = vpack.c.bf16 %v3052_v15, %v3050_v14  ;;  %v4227_v16 = vand.u32 4294901760, %v3012_v41  ;;  %v4228_v32 = vand.u32 4294901760, %v3014_v42  ;;  %v4230_v26 = vand.u32 4294901760, %v3022_v49 }
  0xd3   : > { %605 = vmatmul.mubr.f32.vlgmr.msra.gmra.mrb[0].mxu0 %v4218_v9  ;;  %2382 = vmatprep.subr.bf16.mxu1 %v2381_v43  ;;  %v2203_v43 = vpack.c.bf16 %v3089_v37, %v3085_v22  ;;  %v3519_v25 = vpack.c.bf16 %v4223_v17, %v4222_v18  ;;  %v4229_v17 = vand.u32 4294901760, %v3018_v47  ;;  %v4231_v59 = vand.u32 4294901760, %v3025_v51 }
  0xd4   : > { %2192 = vmatpush1.bf16.msra.mxu0 %v2191_v5  ;;  %v4219_v5 = vld [vmem:[#allocation37_spill] sm:$0xff]  ;;  %739 = vmatprep.mubr.f32.mxu0 %v4221_v7  ;;  %v3532_v20 = vpack.c.bf16 %v4227_v16, %v4226_v23  ;;  %v4232_v40 = vand.u32 4294901760, %v3027_v53  ;;  %v4233_v41 = vand.u32 4294901760, %v3033_v62  ;;  %v4234_v42 = vand.u32 4294901760, %v3035_v63 }
  0xd5   : > { %2194 = vmatprep.subr.bf16.mxu0 %v2193_v30  ;;  %1460 = vmatmul.mubr.f32.vlgmr.msra.gmra.mrb[0].mxu1 %v4218_v9  ;;  %v2205_v30 = vpack.c.bf16 %v4220_v38, %v4219_v5  ;;  %v4225_v9 = vand.u32 4294901760, %v4217_v48  ;;  %v3538_v18 = vpack.c.bf16 %v4229_v17, %v4228_v32  ;;  %v4235_v47 = vand.u32 4294901760, %v3039_v6 }
  0xd6   : > { %2384 = vmatpush1.bf16.msra.mxu1 %v2383_v56  ;;  %1594 = vmatprep.mubr.f32.mxu1 %v4221_v7  ;;  %v3550_v23 = vpack.c.bf16 %v4233_v41, %v4232_v40  ;;  %v4237_v49 = vand.u32 4294901760, %v3046_v12  ;;  %v4238_v48 = vand.u32 4294901760, %v3050_v14  ;;  %v4239_v53 = vand.u32 4294901760, %v3052_v15  ;;  %v4256_v41 = vld [vmem:[#allocation39_spill] sm:$0xff] }
  0xd7   : > { %v3526_v27 = vpack.c.bf16 %v4225_v9, %v4224_v4  ;;  %2386 = vmatprep.subr.bf16.mxu1 %v2385_v31  ;;  %v3544_v4 = vpack.c.bf16 %v4231_v59, %v4230_v26  ;;  %v3556_v16 = vpack.c.bf16 %v4235_v47, %v4234_v42  ;;  %v4236_v9 = vand.u32 4294901760, %v3043_v8  ;;  %v4252_v59 = vld [vmem:[#allocation35_spill] sm:$0xff] }
  0xd8   : > { %2196 = vmatpush1.bf16.msra.mxu0 %v2195_v11  ;;  %v3568_v62 = vpack.c.bf16 %v4239_v53, %v4238_v48  ;;  %v4240_v56 = vand.u32 4294901760, %v3059_v35  ;;  %v4241_v63 = vand.u32 4294901760, %v3061_v36  ;;  %v4242_v31 = vand.u32 4294901760, %v3065_v45  ;;  %v4259_v47 = vld [vmem:[#allocation43_spill] sm:$0xff] }
  0xd9   : > { %2198 = vmatprep.subr.bf16.mxu0 %v2197_v39  ;;  %v3562_v51 = vpack.c.bf16 %v4237_v49, %v4236_v9  ;;  %v4243_v8 = vand.u32 4294901760, %v3067_v50  ;;  %v4244_v12 = vand.u32 4294901760, %v3071_v54  ;;  %v4245_v14 = vand.u32 4294901760, %v3075_v58  ;;  %v4250_v50 = vld [vmem:[#allocation34_spill] sm:$0xff]  ;;  %v4261_v49 = vld [vmem:[#allocation44_spill] sm:$0xff] }
  0xda   : > { %v3574_v6 = vpack.c.bf16 %v4241_v63, %v4240_v56  ;;  %v4246_v15 = vand.u32 4294901760, %v3079_v60  ;;  %v4247_v35 = vand.u32 4294901760, %v3082_v2  ;;  %v4248_v36 = vand.u32 4294901760, %v3085_v22  ;;  %2388 = vmatpush1.bf16.msra.mxu1 %v2387_v13  ;;  %v4264_v56 = vld [vmem:[#allocation46_spill] sm:$0xff]  ;;  %v4266_v63 = vld [vmem:[#allocation47_spill] sm:$0xff] }
  0xdb   : > { %v3580_v11 = vpack.c.bf16 %v4243_v8, %v4242_v31  ;;  %v3586_v39 = vpack.c.bf16 %v4245_v14, %v4244_v12  ;;  %v4249_v45 = vand.u32 4294901760, %v3089_v37  ;;  %v4251_v26 = vand.u32 4294901760, %v4250_v50  ;;  %2390 = vmatprep.subr.bf16.mxu1 %v2389_v61  ;;  %v4271_v12 = vld [vmem:[#allocation50_spill] sm:$0xff] }
  0xdc   : > { %v3592_v32 = vpack.c.bf16 %v4247_v35, %v4246_v15  ;;  %v4253_v54 = vand.u32 4294901760, %v4252_v59  ;;  %v4254_v58 = vand.u32 4294901760, %v4219_v5  ;;  %v4255_v60 = vand.u32 4294901760, %v4220_v38  ;;  %2200 = vmatpush1.bf16.msra.mxu0 %v2199_v34  ;;  %v4269_v38 = vld [vmem:[#allocation49_spill] sm:$0xff]  ;;  %v4274_v35 = vld [vmem:[#allocation51_spill] sm:$0xff] }
  0xdd   : > { %v3598_v17 = vpack.c.bf16 %v4249_v45, %v4248_v36  ;;  %v4257_v42 = vand.u32 4294901760, %v4256_v41  ;;  %v4258_v22 = vand.u32 4294901760, %v4199_v52  ;;  %v4260_v9 = vand.u32 4294901760, %v4259_v47  ;;  %v4276_v45 = vld [vmem:[#allocation53_spill] sm:$0xff]  ;;  %2202 = vmatprep.subr.bf16.mxu0 %v2201_v28 }
  0xde   : > { %v3604_v40 = vpack.c.bf16 %v4253_v54, %v4251_v26  ;;  %v3610_v2 = vpack.c.bf16 %v4255_v60, %v4254_v58  ;;  %v4262_v48 = vand.u32 4294901760, %v4261_v49  ;;  %v4265_v13 = vand.u32 4294901760, %v4264_v56  ;;  %2392 = vmatpush1.bf16.msra.mxu1 %v2391_v57 }
  0xdf   : > { %v3616_v37 = vpack.c.bf16 %v4258_v22, %v4257_v42  ;;  %v4267_v5 = vand.u32 4294901760, %v4266_v63  ;;  %v4270_v8 = vand.u32 4294901760, %v4269_v38  ;;  %v4272_v14 = vand.u32 4294901760, %v4271_v12  ;;  %2394 = vmatprep.subr.bf16.mxu1 %v2393_v0 }
  0xe0   : > { %v3622_v53 = vpack.c.bf16 %v4262_v48, %v4260_v9  ;;  %v4275_v36 = vand.u32 4294901760, %v4274_v35  ;;  %v4277_v26 = vand.u32 4294901760, %v4276_v45  ;;  %v4279_v58 = vand.u32 4294901760, %v4207_v21  ;;  %v4286_v48 = vld [vmem:[#allocation62_spill] sm:$0xff]  ;;  %2204 = vmatpush1.bf16.msra.mxu0 %v2203_v43 }
  0xe1   : > { %v3628_v31 = vpack.c.bf16 %v4267_v5, %v4265_v13  ;;  %v3634_v15 = vpack.c.bf16 %v4272_v14, %v4270_v8  ;;  %v4280_v60 = vand.u32 4294901760, %v4208_v44  ;;  %v4282_v61 = vand.u32 4294901760, %v4209_v10  ;;  %v4289_v8 = vld [vmem:[#allocation63_spill] sm:$0xff]  ;;  %2206 = vmatprep.subr.bf16.mxu0 %v2205_v30 }
  0xe2   : > { %4263 = vst [vmem:[#allocation41_spill] sm:$0xff] %v3622_v53  ;;  %v3640_v54 = vpack.c.bf16 %v4277_v26, %v4275_v36  ;;  %v4283_v34 = vand.u32 4294901760, %v4210_v19  ;;  %v4285_v9 = vand.u32 4294901760, %v4211_v24  ;;  %v4287_v13 = vand.u32 4294901760, %v4286_v48 }
  0xe3   : > { %4268 = vst [vmem:[#allocation55_spill] sm:$0xff] %v3628_v31  ;;  %4273 = vst [vmem:[#allocation56_spill] sm:$0xff] %v3634_v15  ;;  %v3646_v42 = vpack.c.bf16 %v4280_v60, %v4279_v58  ;;  %v4290_v14 = vand.u32 4294901760, %v4289_v8  ;;  %v4291_v36 = vand.u32 4294901760, %v3166_v1  ;;  %v4293_v28 = vand.u32 4294901760, %v3170_v29 }
  0xe4   : > { %4278 = vst [vmem:[#allocation58_spill] sm:$0xff] %v3640_v54  ;;  %v3652_v22 = vpack.c.bf16 %v4283_v34, %v4282_v61  ;;  %v3658_v5 = vpack.c.bf16 %v4287_v13, %v4285_v9  ;;  %v4294_v58 = vand.u32 4294901760, %v3172_v46  ;;  %v4296_v61 = vand.u32 4294901760, %v3176_v55  ;;  %v4300_v13 = vld [vmem:[#allocation68_spill] sm:$0xff] }
  0xe5   : > { %4281 = vst [vmem:[#allocation59_spill] sm:$0xff] %v3646_v42  ;;  %v3664_v26 = vpack.c.bf16 %v4291_v36, %v4290_v14  ;;  %v4297_v34 = vand.u32 4294901760, %v3178_v3  ;;  %v4299_v9 = vand.u32 4294901760, %v3184_v33  ;;  %v4303_v14 = vld [vmem:[#allocation69_spill] sm:$0xff]  ;;  %v2209_v57 = vpack.c.bf16 %v4271_v12, %v4269_v38  ;;  %v4325_v38 = vld [vmem:[#allocation27_spill] sm:$0xff]  ;;  %v4326_v12 = vld [vmem:[#allocation28_spill] sm:$0xff] }
  0xe6   : > { %4284 = vst [vmem:[#allocation61_spill] sm:$0xff] %v3652_v22  ;;  %4288 = vst [vmem:[#allocation16_spill] sm:$0xff] %v3658_v5  ;;  %v3670_v60 = vpack.c.bf16 %v4294_v58, %v4293_v28  ;;  %v4301_v5 = vand.u32 4294901760, %v4300_v13  ;;  %v4304_v36 = vand.u32 4294901760, %v4303_v14  ;;  %v4307_v28 = vld [vmem:[#allocation73_spill] sm:$0xff]  ;;  %v2401_v0 = vpack.c.bf16 %v4276_v45, %v4274_v35  ;;  %v4329_v45 = vld [vmem:[#allocation31_spill] sm:$0xff] }
  0xe7   : > { %4292 = vst [vmem:[#allocation18_spill] sm:$0xff] %v3664_v26  ;;  %v3676_v22 = vpack.c.bf16 %v4297_v34, %v4296_v61  ;;  %v4305_v26 = vld [vmem:[#allocation71_spill] sm:$0xff]  ;;  %v4308_v58 = vand.u32 4294901760, %v4307_v28  ;;  %v2395_v61 = vpack.c.bf16 %v4252_v59, %v4250_v50  ;;  %v4311_v34 = vld [vmem:[#allocation76_spill] sm:$0xff]  ;;  %v2399_v50 = vpack.c.bf16 %v4266_v63, %v4264_v56  ;;  %v4323_v56 = vld [vmem:[#allocation26_spill] sm:$0xff] }
  0xe8   : > { %4295 = vst [vmem:[#allocation20_spill] sm:$0xff] %v3670_v60  ;;  %v3682_v42 = vpack.c.bf16 %v4301_v5, %v4299_v9  ;;  %v4306_v54 = vand.u32 4294901760, %v4305_v26  ;;  %v4309_v60 = vld [vmem:[#allocation74_spill] sm:$0xff]  ;;  %v4313_v5 = vld [vmem:[#allocation77_spill] sm:$0xff]  ;;  %v2211_v43 = vpack.c.bf16 %v4208_v44, %v4207_v21  ;;  %v2403_v30 = vpack.c.bf16 %v4210_v19, %v4209_v10 }
  0xe9   : > { %4298 = vst [vmem:[#allocation37_spill] sm:$0xff] %v3676_v22  ;;  %v4310_v15 = vand.u32 4294901760, %v4309_v60  ;;  %v4312_v22 = vand.u32 4294901760, %v4311_v34  ;;  %v4314_v9 = vand.u32 4294901760, %v4313_v5  ;;  %2396 = vmatpush1.bf16.msra.mxu1 %v2395_v61  ;;  %v2405_v59 = vpack.c.bf16 %v3166_v1, %v4289_v8  ;;  %v4315_v1 = vld [vmem:[#allocation13_spill] sm:$0xff]  ;;  %v4339_v61 = vld [vmem:[#allocation60_spill] sm:$0xff] }
  0xea   : > { %4302 = vst [vmem:[#allocation38_spill] sm:$0xff] %v3682_v42  ;;  %v3688_v31 = vpack.c.bf16 %v4306_v54, %v4304_v36  ;;  %v2397_v54 = vpack.c.bf16 %v4199_v52, %v4256_v41  ;;  %v2207_v36 = vpack.c.bf16 %v4261_v49, %v4259_v47  ;;  %v2213_v52 = vpack.c.bf16 %v4286_v48, %v4211_v24  ;;  %v4320_v24 = vld [vmem:[#allocation21_spill] sm:$0xff]  ;;  %v4321_v47 = vld [vmem:[#allocation23_spill] sm:$0xff]  ;;  %v4322_v49 = vld [vmem:[#allocation24_spill] sm:$0xff] }
  0xeb   : > { %v3694_v53 = vpack.c.bf16 %v4310_v15, %v4308_v58  ;;  %v3702_v42 = vpack.c.bf16 %v4314_v9, %v4312_v22  ;;  %v2215_v41 = vpack.c.bf16 %v3172_v46, %v3170_v29  ;;  %v2217_v21 = vpack.c.bf16 %v4300_v13, %v3184_v33  ;;  %v4316_v29 = vld [vmem:[#allocation79_spill] sm:$0xff]  ;;  %v4319_v33 = vld [vmem:[#allocation22_spill] sm:$0xff]  ;;  %v4324_v63 = vld [vmem:[#allocation25_spill] sm:$0xff] }
  0xec   : > { %2398 = vmatprep.subr.bf16.mxu1 %v2397_v54  ;;  %2208 = vmatpush1.bf16.msra.mxu0 %v2207_v36  ;;  %v2407_v44 = vpack.c.bf16 %v3178_v3, %v3176_v55  ;;  %v2409_v10 = vpack.c.bf16 %v4305_v26, %v4303_v14  ;;  %v2219_v19 = vpack.c.bf16 %v4309_v60, %v4307_v28  ;;  %v4317_v55 = vld [vmem:[#allocation17_spill] sm:$0xff]  ;;  %v4318_v3 = vld [vmem:[#allocation19_spill] sm:$0xff]  ;;  %v4327_v15 = vld [vmem:[#allocation30_spill] sm:$0xff] }
  0xed   : > { %2210 = vmatprep.subr.bf16.mxu0 %v2209_v57  ;;  %2400 = vmatpush1.bf16.msra.mxu1 %v2399_v50  ;;  %v2411_v46 = vpack.c.bf16 %v4313_v5, %v4311_v34  ;;  %v4328_v35 = vld [vmem:[#allocation29_spill] sm:$0xff]  ;;  %v4330_v22 = vld [vmem:[#allocation32_spill] sm:$0xff]  ;;  %v4334_v60 = vld [vmem:[#allocation42_spill] sm:$0xff] }
  0xee   : > { %2402 = vmatprep.subr.bf16.mxu1 %v2401_v0  ;;  %v4331_v48 = vld [vmem:[#allocation36_spill] sm:$0xff]  ;;  %v4332_v8 = vld [vmem:[#allocation33_spill] sm:$0xff]  ;;  %v4338_v58 = vld [vmem:[#allocation54_spill] sm:$0xff] }
  0xef   : > { %v4333_v26 = vld [vmem:[#allocation40_spill] sm:$0xff]  ;;  %v4336_v14 = vld [vmem:[#allocation45_spill] sm:$0xff]  ;;  %v4343_v54 = vld [vmem:[#allocation67_spill] sm:$0xff] }
  0xf0   : > { %2212 = vmatpush1.bf16.msra.mxu0 %v2211_v43  ;;  %v4335_v13 = vld [vmem:[#allocation48_spill] sm:$0xff]  ;;  %v4340_v34 = vld [vmem:[#allocation57_spill] sm:$0xff]  ;;  %v4344_v36 = vld [vmem:[#allocation14_spill] sm:$0xff] }
  0xf1   : > { %2214 = vmatprep.subr.bf16.mxu0 %v2213_v52  ;;  %2404 = vmatpush1.bf16.msra.mxu1 %v2403_v30  ;;  %v4337_v28 = vld [vmem:[#allocation52_spill] sm:$0xff]  ;;  %v4342_v9 = vld [vmem:[#allocation65_spill] sm:$0xff]  ;;  %v4345_v57 = vand.u32 4294901760, %v4344_v36  ;;  %v4346_v50 = vld [vmem:[#allocation15_spill] sm:$0xff] }
  0xf2   : > { %2406 = vmatprep.subr.bf16.mxu1 %v2405_v59  ;;  %v4341_v5 = vld [vmem:[#allocation64_spill] sm:$0xff]  ;;  %v4347_v0 = vand.u32 4294901760, %v4346_v50  ;;  %v4348_v52 = vld [vmem:[#allocation66_spill] sm:$0xff] }
  0xf3   : > { %v4349_v30 = vld [vmem:[#allocation70_spill] sm:$0xff]  ;;  %v4350_v59 = vld [vmem:[#allocation72_spill] sm:$0xff] }
  0xf4   : > { %2216 = vmatpush1.bf16.msra.mxu0 %v2215_v41  ;;  %v2253_v43 = vpack.c.bf16 %v4347_v0, %v4345_v57  ;;  %v4351_v41 = vld [vmem:[#allocation75_spill] sm:$0xff] }
  0xf5   : > { %2218 = vmatprep.subr.bf16.mxu0 %v2217_v21  ;;  %2408 = vmatpush1.bf16.msra.mxu1 %v2407_v44  ;;  %v4352_v21 = vld [vmem:[#allocation80_spill] sm:$0xff] }
  0xf6   : > { %2410 = vmatprep.subr.bf16.mxu1 %v2409_v10 }
  0xf8   : > { %2220 = vmatpush1.bf16.msra.mxu0 %v2219_v19 }
  0xf9   : > { %2222 = vmatprep.subr.bf16.mxu0 %v4315_v1  ;;  %2412 = vmatpush1.bf16.msra.mxu1 %v2411_v46 }
  0xfa   : > { %2414 = vmatprep.subr.bf16.mxu1 %v4317_v55 }
  0xfb   : > { %742 = vmatmul.mubr.f32.vlgmr.msra.gmra.mrb[0].mxu0 %v4316_v29 }
  0xfc   : > { %2224 = vmatpush1.bf16.msra.mxu0 %v4318_v3  ;;  %844 = vmatprep.mubr.f32.mxu0 %v4221_v7 }
  0xfd   : > { %2226 = vmatprep.subr.bf16.mxu0 %v4319_v33  ;;  %1597 = vmatmul.mubr.f32.vlgmr.msra.gmra.mrb[0].mxu1 %v4316_v29 }
  0xfe   : > { %2416 = vmatpush1.bf16.msra.mxu1 %v4320_v24  ;;  %1699 = vmatprep.mubr.f32.mxu1 %v4221_v7 }
  0xff   : > { %2418 = vmatprep.subr.bf16.mxu1 %v4321_v47 }
 0x100   : > { %2228 = vmatpush1.bf16.msra.mxu0 %v4322_v49 }
 0x101   : > { %2230 = vmatprep.subr.bf16.mxu0 %v4323_v56 }
 0x102   : > { %2420 = vmatpush1.bf16.msra.mxu1 %v4324_v63 }
 0x103   : > { %2422 = vmatprep.subr.bf16.mxu1 %v4325_v38 }
 0x104   : > { %2232 = vmatpush1.bf16.msra.mxu0 %v4326_v12 }
 0x105   : > { %2234 = vmatprep.subr.bf16.mxu0 %v4327_v15 }
 0x106   : > { %2424 = vmatpush1.bf16.msra.mxu1 %v4328_v35 }
 0x107   : > { %2426 = vmatprep.subr.bf16.mxu1 %v4329_v45 }
 0x108   : > { %2236 = vmatpush1.bf16.msra.mxu0 %v4330_v22 }
 0x109   : > { %2238 = vmatprep.subr.bf16.mxu0 %v4331_v48 }
 0x10a   : > { %2428 = vmatpush1.bf16.msra.mxu1 %v4332_v8 }
 0x10b   : > { %2430 = vmatprep.subr.bf16.mxu1 %v4333_v26 }
 0x10c   : > { %2240 = vmatpush1.bf16.msra.mxu0 %v4334_v60 }
 0x10d   : > { %2242 = vmatprep.subr.bf16.mxu0 %v4335_v13 }
 0x10e   : > { %2432 = vmatpush1.bf16.msra.mxu1 %v4336_v14 }
 0x10f   : > { %2434 = vmatprep.subr.bf16.mxu1 %v4337_v28 }
 0x110   : > { %2244 = vmatpush1.bf16.msra.mxu0 %v4338_v58 }
 0x111   : > { %2246 = vmatprep.subr.bf16.mxu0 %v4339_v61 }
 0x112   : > { %2436 = vmatpush1.bf16.msra.mxu1 %v4340_v34 }
 0x113   : > { %2438 = vmatprep.subr.bf16.mxu1 %v4341_v5 }
 0x114   : > { %2248 = vmatpush1.bf16.msra.mxu0 %v4342_v9 }
 0x115   : > { %2250 = vmatprep.subr.bf16.mxu0 %v4343_v54 }
 0x116   : > { %2440 = vmatpush1.bf16.msra.mxu1 %v4348_v52 }
 0x117   : > { %2442 = vmatprep.subr.bf16.mxu1 %v4349_v30 }
 0x118   : > { %2252 = vmatpush1.bf16.msra.mxu0 %v4350_v59 }
 0x119   : > { %2254 = vmatprep.subr.bf16.mxu0 %v2253_v43 }
 0x11a   : > { %2444 = vmatpush1.bf16.msra.mxu1 %v4351_v41 }
 0x11b   : > { %848 = vmatmul.mubr.f32.vlgmr.msra.gmra.mrb[0].mxu0 %v4352_v21  ;;  %2446 = vmatprep.subr.bf16.mxu1 %v3519_v25  ;;  %v4354_v25 = vld [vmem:[#allocation56_spill] sm:$0xff] }
 0x11c   : > { %2256 = vmatpush1.bf16.msra.mxu0 %v3526_v27  ;;  %1014 = vmatprep.mubr.f32.mxu0 %v4221_v7  ;;  %v4353_v27 = vld [vmem:[#allocation41_spill] sm:$0xff] }
 0x11d   : > { %2258 = vmatprep.subr.bf16.mxu0 %v3538_v18  ;;  %1703 = vmatmul.mubr.f32.vlgmr.msra.gmra.mrb[0].mxu1 %v4352_v21  ;;  %v4356_v18 = vld [vmem:[#allocation58_spill] sm:$0xff] }
 0x11e   : > { %2448 = vmatpush1.bf16.msra.mxu1 %v3532_v20  ;;  %1869 = vmatprep.mubr.f32.mxu1 %v4221_v7  ;;  %v4355_v20 = vld [vmem:[#allocation55_spill] sm:$0xff] }
 0x11f   : > { %2450 = vmatprep.subr.bf16.mxu1 %v3544_v4  ;;  %v4357_v4 = vld [vmem:[#allocation59_spill] sm:$0xff] }
 0x120   : > { %2260 = vmatpush1.bf16.msra.mxu0 %v3550_v23  ;;  %v4358_v23 = vld [vmem:[#allocation16_spill] sm:$0xff] }
 0x121   : > { %2262 = vmatprep.subr.bf16.mxu0 %v3562_v51  ;;  %v4360_v51 = vld [vmem:[#allocation18_spill] sm:$0xff] }
 0x122   : > { %2452 = vmatpush1.bf16.msra.mxu1 %v3556_v16  ;;  %v4359_v16 = vld [vmem:[#allocation61_spill] sm:$0xff] }
 0x123   : > { %2454 = vmatprep.subr.bf16.mxu1 %v3568_v62  ;;  %v4361_v62 = vld [vmem:[#allocation20_spill] sm:$0xff] }
 0x124   : > { %2264 = vmatpush1.bf16.msra.mxu0 %v3574_v6  ;;  %v4362_v6 = vld [vmem:[#allocation38_spill] sm:$0xff] }
 0x125   : > { %2266 = vmatprep.subr.bf16.mxu0 %v3586_v39  ;;  %v4364_v39 = vld [vmem:[#allocation78_spill] sm:$0xff] }
 0x126   : > { %2456 = vmatpush1.bf16.msra.mxu1 %v3580_v11  ;;  %v4363_v11 = vld [vmem:[#allocation37_spill] sm:$0xff] }
 0x127   : > { %2458 = vmatprep.subr.bf16.mxu1 %v3592_v32 }
 0x128   : > { %2268 = vmatpush1.bf16.msra.mxu0 %v3598_v17 }
 0x129   : > { %2270 = vmatprep.subr.bf16.mxu0 %v3610_v2 }
 0x12a   : > { %2460 = vmatpush1.bf16.msra.mxu1 %v3604_v40 }
 0x12b   : > { %2462 = vmatprep.subr.bf16.mxu1 %v3616_v37 }
 0x12c   : > { %2272 = vmatpush1.bf16.msra.mxu0 %v4353_v27 }
 0x12d   : > { %2274 = vmatprep.subr.bf16.mxu0 %v4354_v25 }
 0x12e   : > { %2464 = vmatpush1.bf16.msra.mxu1 %v4355_v20 }
 0x12f   : > { %2466 = vmatprep.subr.bf16.mxu1 %v4356_v18 }
 0x130   : > { %2276 = vmatpush1.bf16.msra.mxu0 %v4357_v4 }
 0x131   : > { %2278 = vmatprep.subr.bf16.mxu0 %v4358_v23 }
 0x132   : > { %2468 = vmatpush1.bf16.msra.mxu1 %v4359_v16 }
 0x133   : > { %2470 = vmatprep.subr.bf16.mxu1 %v4360_v51 }
 0x134   : > { %2280 = vmatpush1.bf16.msra.mxu0 %v4361_v62 }
 0x135   : > { %2282 = vmatprep.subr.bf16.mxu0 %v4362_v6 }
 0x136   : > { %2472 = vmatpush1.bf16.msra.mxu1 %v4363_v11 }
 0x137   : > { %2474 = vmatprep.subr.bf16.mxu1 %v3688_v31 }
 0x138   : > { %2284 = vmatpush1.bf16.msra.mxu0 %v3694_v53 }
 0x139   : > { %2286 = vmatprep.subr.bf16.mxu0 %v4315_v1 }
 0x13a   : > { %2476 = vmatpush1.bf16.msra.mxu1 %v3702_v42 }
 0x13b   : > { %1016 = vmatmul.mubr.f32.vlgmr.msra.gmra.mrb[0].mxu0 %v4364_v39  ;;  %2478 = vmatprep.subr.bf16.mxu1 %v4317_v55 }
 0x13c   : > { %2288 = vmatpush1.bf16.msra.mxu0 %v4318_v3  ;;  %1118 = vmatprep.mubr.f32.mxu0 %v4221_v7 }
 0x13d   : > { %2290 = vmatprep.subr.bf16.mxu0 %v4319_v33  ;;  %1871 = vmatmul.mubr.f32.vlgmr.msra.gmra.mrb[0].mxu1 %v4364_v39 }
 0x13e   : > { %2480 = vmatpush1.bf16.msra.mxu1 %v4320_v24  ;;  %1973 = vmatprep.mubr.f32.mxu1 %v4221_v7 }
 0x13f   : > { %2482 = vmatprep.subr.bf16.mxu1 %v4321_v47 }
 0x140   : > { %2292 = vmatpush1.bf16.msra.mxu0 %v4322_v49 }
 0x141   : > { %2294 = vmatprep.subr.bf16.mxu0 %v4323_v56 }
 0x142   : > { %2484 = vmatpush1.bf16.msra.mxu1 %v4324_v63 }
 0x143   : > { %2486 = vmatprep.subr.bf16.mxu1 %v4325_v38 }
 0x144   : > { %2296 = vmatpush1.bf16.msra.mxu0 %v4326_v12 }
 0x145   : > { %2298 = vmatprep.subr.bf16.mxu0 %v4327_v15 }
 0x146   : > { %2488 = vmatpush1.bf16.msra.mxu1 %v4328_v35 }
 0x147   : > { %2490 = vmatprep.subr.bf16.mxu1 %v4329_v45 }
 0x148   : > { %2300 = vmatpush1.bf16.msra.mxu0 %v4330_v22 }
 0x149   : > { %2302 = vmatprep.subr.bf16.mxu0 %v4331_v48 }
 0x14a   : > { %2492 = vmatpush1.bf16.msra.mxu1 %v4332_v8 }
 0x14b   : > { %2494 = vmatprep.subr.bf16.mxu1 %v4333_v26 }
 0x14c   : > { %2304 = vmatpush1.bf16.msra.mxu0 %v4334_v60 }
 0x14d   : > { %2306 = vmatprep.subr.bf16.mxu0 %v4335_v13 }
 0x14e   : > { %2496 = vmatpush1.bf16.msra.mxu1 %v4336_v14 }
 0x14f   : > { %2498 = vmatprep.subr.bf16.mxu1 %v4337_v28 }
 0x150   : > { %2308 = vmatpush1.bf16.msra.mxu0 %v4338_v58 }
 0x151   : > { %2310 = vmatprep.subr.bf16.mxu0 %v4339_v61 }
 0x152   : > { %2500 = vmatpush1.bf16.msra.mxu1 %v4340_v34 }
 0x153   : > { %2502 = vmatprep.subr.bf16.mxu1 %v4341_v5 }
 0x154   : > { %2312 = vmatpush1.bf16.msra.mxu0 %v4342_v9 }
 0x155   : > { %2314 = vmatprep.subr.bf16.mxu0 %v4343_v54 }
 0x156   : > { %2504 = vmatpush1.bf16.msra.mxu1 %v4348_v52 }
 0x157   : > { %2506 = vmatprep.subr.bf16.mxu1 %v4349_v30 }
 0x158   : > { %2316 = vmatpush1.bf16.msra.mxu0 %v4350_v59 }
 0x15a   : > { %2508 = vmatpush1.bf16.msra.mxu1 %v4351_v41 }
 0x15b   : > { %1120 = vmatmul.mubr.f32.vlgmr.msra.gmra.mrb[0].mxu0 %v4364_v39 }
 0x15d   : > { %1975 = vmatmul.mubr.f32.vlgmr.msra.gmra.mrb[0].mxu1 %v4364_v39 }
 0x22e   : > { %v1121_v7 = vpop.f32.mrb[0].mxu0 }
 0x22f   : > { %1981 = vst [vmem:[%s204_s8] sm:$0xff] %v1121_v7  ;;  %v1123_v32 = vpop.f32.mrb[1].mxu0 }
 0x230   : > { %1982 = vst [vmem:[%s204_s8 + $0x8] sm:$0xff] %v1123_v32  ;;  %v1976_v17 = vpop.f32.mrb[0].mxu1 }
 0x231   : > { %1983 = vst [vmem:[%s204_s8 + $0x10] sm:$0xff] %v1976_v17  ;;  %v1978_v40 = vpop.f32.mrb[1].mxu1 }
 0x232   : > { %1984 = vst [vmem:[%s204_s8 + $0x18] sm:$0xff] %v1978_v40 }
 0x233   : > { %2692 = shalt.err (!%p2689_p7)
}
 0x234   : > { %s2693_s7 = scalar_lea.hbm %s3855_s12, 512  ;;  %s2697_s1 = scalar_lea.hbm %s3909_s2, 4096 }
 0x235   : > { %p2694_p1 = scmp.ne.s32.totalorder %s3855_s12, %s2693_s7  ;;  %p2698_p9 = scmp.lt.u32.totalorder %s3855_s12, %s3909_s2 }
 0x236   : > { %p2699_p5 = scmp.lt.u32.totalorder %s2697_s1, %s2693_s7  ;;  %p2701_p6 = scmp.lt.u32.totalorder %s2693_s7, %s3855_s12 }
 0x237   : > { %p2695_p2 = pnand %p2694_p1, %p2909_p11 }
 0x238   : > { %p2700_p0 = por %p2699_p5, %p2698_p9 }
 0x239   : > { %p2696_p4 = pneg %p2695_p2 }
 0x23a   : > { %p2702_p8 = por %p2701_p6, %p2700_p0 }
 0x23c   : > { %p2703_p10 = pnand %p2702_p8, %p2696_p4 }
 0x23e   : > { %2706 = shalt.err (!%p2703_p10)
}
 0x23f   : > { %2535 = dma.vmem_to_hbm [thread:$0]  (%p2909_p11), %s3850_s29, 512, %s3855_s12, %s1986_s13  }
 0x240 PF: > { %s4365_s21 = sld [smem:[#allocation11_spill]]  ;;  %p2552_p12 = scmp.ge.s32.totalorder %s2781_s16, 2 }
 0x241   : > { %s2016_s22 = sand.u32 1, %s2753_s9  }
 0x242   : > { %s2017_s23 = scalar_lea.sflag [#allocation4], %s2016_s22 }
 0x246   : > { %p4366_p13 = scmp.ne.s32.totalorder %s4365_s21, 0 }
 0x248   : > { %p2546_p3 = pnand %p2552_p12, %p4366_p13 }
 0x24a   : > { %2748 = dma.done.wait (!%p2546_p3), %s2017_s23, 512  }
 0x24b   : > { %2750 = vsyncadd (!%p2546_p3), %s2017_s23, 4294966784  ;;  %s19_s16 = sadd.s32 1, %s2781_s16   ;;  %s4367_s26 = sld [smem:[#allocation12_spill]] }
 0x24c   : > { %p16_p7 = scmp.ge.s32.totalorder %s19_s16, 6   ;;  %s4368_s9 = smov %s2757_s10 }
 0x24d   : > { %s4369_s10 = smov %s2761_s11  ;;  %s4370_s11 = smov %s2926_s17 }
 0x24e   : > { %s4371_s12 = smov %s2773_s14  ;;  %s4372_s13 = smov %s2777_s15 }
 0x24f   : > { %s4374_s15 = smov %s4380_s27  ;;  %18 = sbr.rel (!%p16_p7) target bundleno = 10 (0xa), region = 77 }
 0x251   : > { %s4373_s14 = smov %s4367_s26 }
 0x256   :  { %2022 = vsyncpa [#allocation3], 1 }
 0x257   :  { %2024 = vsyncpa [#allocation3 + $0x1], 1 }
 0x258   :  { %2025 = vsyncpa [#allocation6], 1 }
 0x259   :  { %2026 = vsyncpa [#allocation4], 1 }
 0x25a   :  { %2028 = vsyncpa [#allocation4 + $0x1], 1 }

</bundles_post_ra>
